<compile_context>
chip_gen: v7x
topology: tpu7x:2x2x1
jax: 0.10.0
libtpu: 0.0.40
codegen_flags: <defaults>
</compile_context>

<pallas_src>
import numpy as np
import jax
import jax.numpy as jnp
from jax import lax
from jax.experimental import pallas as pl
from jax.experimental.pallas import tpu as pltpu

H = W = 7                 # module is built for 7x7 feature maps (fc expects 21*7*7)
WP = 8                    # spatial width zero-padded to 8 -> 64 positions / image
PP = WP * WP              # 64 padded positions per image
NUM_CLASSES = 21
HEAD_PAD = 32             # output classes padded to 32 lanes
EMB_ROWS = 1280
REF_PREC = jax.lax.Precision.HIGHEST   # reference / init-time folds only

# tap offsets in the 8x8-padded flattened layout, k = ky*3 + kx
_TAP_OFFSETS = tuple((ky - 1) * WP + (kx - 1) for ky in range(3) for kx in range(3))


# ---------------------------------------------------------------------------
# Fused Pallas kernel: 2 bottlenecks + folded head + folded fc, one launch.
# Activation layout: channels on sublanes, b*64+p positions on lanes.
# ---------------------------------------------------------------------------
def _fused_kernel(x_ref, mask_ref, w1s_ref, w2s_ref, w3s_ref, wbig_ref,
                  bias_ref, bconst_ref, out_ref, fc_scratch):
    C, L = x_ref.shape                 # (32, B*64)
    Cm = C // 4
    B = L // PP

    mask = mask_ref[...]               # (1, L), 1.0 on valid 7x7 positions
    x = x_ref[...]                     # (C, L) f32, time embedding already added

    def mm(a, b):                      # single-pass bf16 MXU dot, f32 accumulate
        return jnp.dot(a.astype(jnp.bfloat16), b.astype(jnp.bfloat16),
                       preferred_element_type=jnp.float32)

    def conv3x3(h, w2t, b2):
        # pre-mask so pad lanes are zero; every out-of-bounds / wrapped tap read
        # then lands on a zero lane (pads of the same or neighbouring image).
        hm = h * mask                                       # (Cm, L)
        taps = [hm if d == 0 else pltpu.roll(hm, shift=(-d) % L, axis=1)
                for d in _TAP_OFFSETS]                      # 9 single-vreg lane rolls
        hcat = jnp.concatenate(taps, axis=0)                # (9*Cm, L)
        return mm(w2t, hcat) + b2                           # one K=72 MXU dot

    def bottleneck(h, i):
        b1 = bias_ref[:Cm, 3 * i:3 * i + 1]                 # (Cm, 1) lane-broadcast
        b2 = bias_ref[:Cm, 3 * i + 1:3 * i + 2]
        b3 = bias_ref[:, 3 * i + 2:3 * i + 3]               # (C, 1)
        y = jnp.maximum(mm(w1s_ref[i], h) + b1, 0.0)        # 1x1 conv + BN + ReLU
        y = jnp.maximum(conv3x3(y, w2s_ref[i], b2), 0.0)    # 3x3 conv + BN + ReLU
        y = mm(w3s_ref[i], y) + b3                          # 1x1 conv + BN
        return y + h                                        # residual

    feat = bottleneck(x, 0)
    feat = bottleneck(feat, 1)                              # (C, L)

    # per-image (c, p) -> lane flatten for the fc: B*C static half-vreg stores.
    # Pad positions carry garbage but their Wbig rows are zero, so nothing leaks.
    for b in range(B):
        for c in range(C):
            fc_scratch[b:b + 1, c * PP:(c + 1) * PP] = feat[c:c + 1, b * PP:(b + 1) * PP]

    fc_in = fc_scratch[...]                                 # (B, C*64)
    # folded head (Conv(C,C,1)+BN, Conv(C,21,1)) + fc(21*49 -> 21) in one dot
    out_ref[...] = mm(fc_in, wbig_ref[...]) + bconst_ref[...]


# ---------------------------------------------------------------------------
# Wrapper
# ---------------------------------------------------------------------------
@jax.jit
def diffusion_forward(noisy_nchw, t, emb, kp):
    B, C, h, w = noisy_nchw.shape
    assert (h, w) == (H, W) and C % 4 == 0 and C <= 128
    Cm = C // 4
    L = B * PP

    # glue (fused / constant-folded by XLA under jit): swap (B,C) axes, add the
    # gathered time embedding, zero-pad 7x7 -> 8x8, flatten positions onto lanes.
    # TODO(synk): could be absorbed into the kernel via scalar-prefetched t + an
    # in-kernel emb DMA; left in XLA since it is a single tiny fusion.
    x = jnp.transpose(noisy_nchw, (0, 2, 3, 1))                  # (B, 7, 7, C)
    x = x + emb[t][:, None, None, :]
    x = jnp.pad(x, ((0, 0), (0, WP - H), (0, WP - W), (0, 0)))   # (B, 8, 8, C)
    x = jnp.transpose(x.reshape(B * PP, C))                      # (C, B*64)

    # precomputed validity lane-mask (constant under jit)
    p_idx = jnp.arange(PP, dtype=jnp.int32)
    valid = ((p_idx // WP) < H) & ((p_idx % WP) < W)
    mask = jnp.tile(valid.astype(jnp.float32), (B,)).reshape(1, L)

    out = pl.pallas_call(
        _fused_kernel,
        grid=(1,),
        in_specs=[
            pl.BlockSpec((C, L), lambda i: (0, 0)),              # x
            pl.BlockSpec((1, L), lambda i: (0, 0)),              # lane mask
            pl.BlockSpec((2, Cm, C), lambda i: (0, 0, 0)),       # bottleneck conv1 (bf16)
            pl.BlockSpec((2, Cm, 9 * Cm), lambda i: (0, 0, 0)),  # bottleneck conv2 (bf16)
            pl.BlockSpec((2, C, Cm), lambda i: (0, 0, 0)),       # bottleneck conv3 (bf16)
            pl.BlockSpec((C * PP, HEAD_PAD), lambda i: (0, 0)),  # folded head+fc (bf16)
            pl.BlockSpec((C, 8), lambda i: (0, 0)),              # packed biases
            pl.BlockSpec((1, HEAD_PAD), lambda i: (0, 0)),       # folded output bias
        ],
        out_specs=pl.BlockSpec((B, HEAD_PAD), lambda i: (0, 0)),
        out_shape=jax.ShapeDtypeStruct((B, HEAD_PAD), jnp.float32),
        scratch_shapes=[pltpu.VMEM((B, C * PP), jnp.float32)],
        compiler_params=pltpu.CompilerParams(dimension_semantics=("arbitrary",)),
    )(x, mask, kp["w1s"], kp["w2s"], kp["w3s"], kp["wbig"], kp["biases"], kp["bconst"])

    return out[:, :NUM_CLASSES]


# ---------------------------------------------------------------------------
# Deterministic synthetic parameters (BN folded into conv scale/bias)
# ---------------------------------------------------------------------------
def init_params(key, C):
    Cm = C // 4
    keys = list(jax.random.split(key, 10))
    ki = iter(keys)

    def conv_bn(k, cin, cout, ksize=1):
        ks = jax.random.split(k, 6)
        if ksize == 1:
            w = 0.1 * jax.random.normal(ks[0], (cin, cout), jnp.float32)
        else:
            w = 0.1 * jax.random.normal(ks[0], (ksize * ksize, cin, cout), jnp.float32)
        b = 0.05 * jax.random.normal(ks[1], (cout,), jnp.float32)
        gamma = 1.0 + 0.1 * jax.random.normal(ks[2], (cout,), jnp.float32)
        beta = 0.05 * jax.random.normal(ks[3], (cout,), jnp.float32)
        rmean = 0.05 * jax.random.normal(ks[4], (cout,), jnp.float32)
        rvar = 1.0 + 0.1 * jnp.abs(jax.random.normal(ks[5], (cout,), jnp.float32))
        scale = gamma * jax.lax.rsqrt(rvar + 1e-5)          # eval-mode BN fold
        return w * scale, ((b - rmean) * scale + beta).reshape(1, cout)

    def conv_plain(k, cin, cout):
        k1, k2 = jax.random.split(k)
        w = 0.1 * jax.random.normal(k1, (cin, cout), jnp.float32)
        b = 0.05 * jax.random.normal(k2, (cout,), jnp.float32)
        return w, b.reshape(1, cout)

    p = {}
    p["emb"] = 0.1 * jax.random.normal(next(ki), (EMB_ROWS, C), jnp.float32)
    for name in ("b1", "b2"):
        p[name + "w1"], p[name + "b1"] = conv_bn(next(ki), C, Cm, 1)
        p[name + "w2"], p[name + "b2"] = conv_bn(next(ki), Cm, Cm, 3)
        p[name + "w3"], p[name + "b3"] = conv_bn(next(ki), Cm, C, 1)
    p["hw1"], p["hb1"] = conv_bn(next(ki), C, C, 1)
    p["hw2"], p["hb2"] = conv_plain(next(ki), C, NUM_CLASSES)

    k1, k2 = jax.random.split(next(ki))
    p["fc_w_pt"] = 0.05 * jax.random.normal(k1, (NUM_CLASSES, NUM_CLASSES * H * W),
                                            jnp.float32)              # (out, c*h*w)
    p["fc_b"] = 0.05 * jax.random.normal(k2, (NUM_CLASSES,), jnp.float32).reshape(
        1, NUM_CLASSES)
    return p


def pack_kernel_params(p, C):
    """Derive the packed / folded / transposed weights the fused kernel consumes."""
    Cm = C // 4
    kp = {}

    def t1x1(w):                       # (cin, cout) -> (cout, cin)
        return jnp.transpose(w)

    def t3x3(w9):                      # (9, cin, cout) -> (cout, 9*cin), tap-major
        cout, cin = w9.shape[2], w9.shape[1]
        return jnp.transpose(w9, (2, 0, 1)).reshape(cout, 9 * cin)

    kp["w1s"] = jnp.stack([t1x1(p["b1w1"]), t1x1(p["b2w1"])]).astype(jnp.bfloat16)
    kp["w2s"] = jnp.stack([t3x3(p["b1w2"]), t3x3(p["b2w2"])]).astype(jnp.bfloat16)
    kp["w3s"] = jnp.stack([t1x1(p["b1w3"]), t1x1(p["b2w3"])]).astype(jnp.bfloat16)

    # bias columns (sublane vectors, lane-broadcast in-kernel), packed in one slab
    biases = jnp.zeros((C, 8), jnp.float32)
    biases = biases.at[:Cm, 0].set(p["b1b1"][0])
    biases = biases.at[:Cm, 1].set(p["b1b2"][0])
    biases = biases.at[:C, 2].set(p["b1b3"][0])
    biases = biases.at[:Cm, 3].set(p["b2b1"][0])
    biases = biases.at[:Cm, 4].set(p["b2b2"][0])
    biases = biases.at[:C, 5].set(p["b2b3"][0])
    kp["biases"] = biases

    # fold Conv(C,C,1)+BN, Conv(C,21,1) AND fc(21*7*7 -> 21) into a single
    # position-dependent projection Wbig[(c,p), o] plus a constant bias.
    whead = jnp.dot(p["hw1"], p["hw2"], precision=REF_PREC)             # (C, 21)
    bhead = jnp.dot(p["hb1"], p["hw2"], precision=REF_PREC) + p["hb2"]  # (1, 21)

    wf = p["fc_w_pt"].reshape(NUM_CLASSES, NUM_CLASSES, H, W)           # [o, j, y, x]
    wbig = jnp.einsum("cj,ojyx->cyxo", whead, wf, precision=REF_PREC)   # (C, 7, 7, 21)
    wbig_pad = jnp.zeros((C, WP, WP, HEAD_PAD), jnp.float32)
    wbig_pad = wbig_pad.at[:, :H, :W, :NUM_CLASSES].set(wbig)
    # row index = c*64 + y*8 + x matches the in-kernel (c, p) -> lane flatten;
    # pad positions / pad classes are zero rows / columns.
    kp["wbig"] = wbig_pad.reshape(C * PP, HEAD_PAD).astype(jnp.bfloat16)

    bconst = jnp.einsum("j,ojyx->o", bhead[0], wf, precision=REF_PREC) + p["fc_b"][0]
    kp["bconst"] = jnp.zeros((1, HEAD_PAD), jnp.float32).at[0, :NUM_CLASSES].set(bconst)
    return kp


# ---------------------------------------------------------------------------
# Pure-JAX reference (NCHW, lax.conv) for correctness check
# ---------------------------------------------------------------------------
def reference_forward(noisy, t, p):
    B, C, _, _ = noisy.shape
    emb = p["emb"][t]                                       # (B, C)
    feat = noisy + emb[:, :, None, None]

    def conv1x1(h, w, b):
        return jnp.einsum("bchw,cd->bdhw", h, w, precision=REF_PREC) + b.reshape(1, -1, 1, 1)

    def conv3x3(h, w9, b):
        cin, cout = w9.shape[1], w9.shape[2]
        w_oihw = jnp.transpose(w9.reshape(3, 3, cin, cout), (3, 2, 0, 1))
        y = lax.conv_general_dilated(h, w_oihw, (1, 1), "SAME",
                                     dimension_numbers=("NCHW", "OIHW", "NCHW"),
                                     precision=REF_PREC)
        return y + b.reshape(1, -1, 1, 1)

    def bottleneck(h, pre):
        y = jax.nn.relu(conv1x1(h, p[pre + "w1"], p[pre + "b1"]))
        y = jax.nn.relu(conv3x3(y, p[pre + "w2"], p[pre + "b2"]))
        y = conv1x1(y, p[pre + "w3"], p[pre + "b3"])
        return y + h

    feat = bottleneck(feat, "b1")
    feat = bottleneck(feat, "b2")
    feat = conv1x1(feat, p["hw1"], p["hb1"])
    feat = conv1x1(feat, p["hw2"], p["hb2"])                # (B, 21, 7, 7)
    flat = feat.reshape(B, -1)                              # torch .view(B, -1)
    return jnp.dot(flat, p["fc_w_pt"].T, precision=REF_PREC) + p["fc_b"]


if __name__ == "__main__":
    B, C = 2, 32                                            # channels_in=32, spatial 7x7
    key = jax.random.PRNGKey(0)
    k_x, k_t, k_p = jax.random.split(key, 3)

    noisy = jax.random.normal(k_x, (B, C, H, W), jnp.float32)      # NCHW like PyTorch
    t = jax.random.randint(k_t, (B,), 0, EMB_ROWS, jnp.int32)      # timestep indices
    params = init_params(k_p, C)
    kparams = pack_kernel_params(params, C)

    out = diffusion_forward(noisy, t, params["emb"], kparams)
    out = jax.block_until_ready(out)

    ref = reference_forward(noisy, t, params)
    # tolerance sized for single-pass bf16 matmuls (f32 accumulation)
    np.testing.assert_allclose(np.asarray(out), np.asarray(ref), rtol=2e-2, atol=2e-2)
    assert out.shape == (B, NUM_CLASSES)
    print("KERNEL_OK")
</pallas_src>

<mosaic_0001>
module attributes {stable_mosaic.version = 11 : i64} {
  func.func @_fused_kernel(%arg0: i32, %arg1: memref<32x128xf32, #tpu.memory_space<vmem>>, %arg2: memref<1x128xf32, #tpu.memory_space<vmem>>, %arg3: memref<2x8x32xbf16, #tpu.memory_space<vmem>>, %arg4: memref<2x8x72xbf16, #tpu.memory_space<vmem>>, %arg5: memref<2x32x8xbf16, #tpu.memory_space<vmem>>, %arg6: memref<2048x32xbf16, #tpu.memory_space<vmem>>, %arg7: memref<32x8xf32, #tpu.memory_space<vmem>>, %arg8: memref<1x32xf32, #tpu.memory_space<vmem>>, %arg9: memref<2x32xf32, #tpu.memory_space<vmem>>, %arg10: memref<2x2048xf32, #tpu.memory_space<vmem>>) attributes {dimension_semantics = [#tpu.dimension_semantics<arbitrary>], iteration_bounds = array<i64: 1>, scalar_prefetch = 0 : i64, scratch_operands = 1 : i64, tpu.core_type = #tpu.core_type<tc>, window_params = [{pipeline_mode = #tpu.pipeline_mode<synchronous>, transform_indices = @transform_0, window_bounds = array<i64: 32, 128>}, {pipeline_mode = #tpu.pipeline_mode<synchronous>, transform_indices = @transform_1, window_bounds = array<i64: 1, 128>}, {pipeline_mode = #tpu.pipeline_mode<synchronous>, transform_indices = @transform_2, window_bounds = array<i64: 2, 8, 32>}, {pipeline_mode = #tpu.pipeline_mode<synchronous>, transform_indices = @transform_3, window_bounds = array<i64: 2, 8, 72>}, {pipeline_mode = #tpu.pipeline_mode<synchronous>, transform_indices = @transform_4, window_bounds = array<i64: 2, 32, 8>}, {pipeline_mode = #tpu.pipeline_mode<synchronous>, transform_indices = @transform_5, window_bounds = array<i64: 2048, 32>}, {pipeline_mode = #tpu.pipeline_mode<synchronous>, transform_indices = @transform_6, window_bounds = array<i64: 32, 8>}, {pipeline_mode = #tpu.pipeline_mode<synchronous>, transform_indices = @transform_7, window_bounds = array<i64: 1, 32>}, {pipeline_mode = #tpu.pipeline_mode<synchronous>, transform_indices = @transform_8, window_bounds = array<i64: 2, 32>}]} {
    %c0 = arith.constant 0 : index
    %c0_0 = arith.constant 0 : index
    %0 = vector.load %arg2[%c0, %c0_0] : memref<1x128xf32, #tpu.memory_space<vmem>>, vector<1x128xf32>
    %c0_1 = arith.constant 0 : index
    %c0_2 = arith.constant 0 : index
    %1 = vector.load %arg1[%c0_1, %c0_2] : memref<32x128xf32, #tpu.memory_space<vmem>>, vector<32x128xf32>
    %c0_3 = arith.constant 0 : index
    %c0_4 = arith.constant 0 : index
    %2 = vector.load %arg7[%c0_3, %c0_4] : memref<32x8xf32, #tpu.memory_space<vmem>>, vector<8x1xf32>
    %c0_5 = arith.constant 0 : index
    %c1 = arith.constant 1 : index
    %3 = vector.load %arg7[%c0_5, %c1] : memref<32x8xf32, #tpu.memory_space<vmem>>, vector<8x1xf32>
    %c0_6 = arith.constant 0 : index
    %c2 = arith.constant 2 : index
    %4 = vector.load %arg7[%c0_6, %c2] : memref<32x8xf32, #tpu.memory_space<vmem>>, vector<32x1xf32>
    %c0_7 = arith.constant 0 : index
    %c0_8 = arith.constant 0 : index
    %c0_9 = arith.constant 0 : index
    %5 = vector.load %arg3[%c0_7, %c0_8, %c0_9] : memref<2x8x32xbf16, #tpu.memory_space<vmem>>, vector<1x8x32xbf16>
    %6 = vector.shape_cast %5 : vector<1x8x32xbf16> to vector<8x32xbf16>
    %7 = arith.truncf %1 : vector<32x128xf32> to vector<32x128xbf16>
    %cst = arith.constant dense<0.000000e+00> : vector<8x128xf32>
    %8 = tpu.matmul %6, %7, %cst {dimension_numbers = #tpu.dot_dimension_numbers<[1], [0], [0], [1], [0, 0, 1, 1], [], []>} : vector<8x32xbf16>, vector<32x128xbf16>, vector<8x128xf32> -> vector<8x128xf32>
    %9 = vector.broadcast %2 : vector<8x1xf32> to vector<8x128xf32>
    %10 = arith.addf %8, %9 : vector<8x128xf32>
    %cst_10 = arith.constant 0.000000e+00 : f32
    %11 = vector.broadcast %cst_10 : f32 to vector<8x128xf32>
    %12 = arith.maximumf %10, %11 : vector<8x128xf32>
    %c0_11 = arith.constant 0 : index
    %c0_12 = arith.constant 0 : index
    %c0_13 = arith.constant 0 : index
    %13 = vector.load %arg4[%c0_11, %c0_12, %c0_13] : memref<2x8x72xbf16, #tpu.memory_space<vmem>>, vector<1x8x72xbf16>
    %14 = vector.shape_cast %13 : vector<1x8x72xbf16> to vector<8x72xbf16>
    %15 = vector.broadcast %0 : vector<1x128xf32> to vector<8x128xf32>
    %16 = arith.mulf %12, %15 : vector<8x128xf32>
    %c9_i32 = arith.constant 9 : i32
    %17 = tpu.dynamic_rotate %16 by %c9_i32 dim 1 : vector<8x128xf32>, i32 -> vector<8x128xf32>
    %c8_i32 = arith.constant 8 : i32
    %18 = tpu.dynamic_rotate %16 by %c8_i32 dim 1 : vector<8x128xf32>, i32 -> vector<8x128xf32>
    %c7_i32 = arith.constant 7 : i32
    %19 = tpu.dynamic_rotate %16 by %c7_i32 dim 1 : vector<8x128xf32>, i32 -> vector<8x128xf32>
    %c1_i32 = arith.constant 1 : i32
    %20 = tpu.dynamic_rotate %16 by %c1_i32 dim 1 : vector<8x128xf32>, i32 -> vector<8x128xf32>
    %c127_i32 = arith.constant 127 : i32
    %21 = tpu.dynamic_rotate %16 by %c127_i32 dim 1 : vector<8x128xf32>, i32 -> vector<8x128xf32>
    %c121_i32 = arith.constant 121 : i32
    %22 = tpu.dynamic_rotate %16 by %c121_i32 dim 1 : vector<8x128xf32>, i32 -> vector<8x128xf32>
    %c120_i32 = arith.constant 120 : i32
    %23 = tpu.dynamic_rotate %16 by %c120_i32 dim 1 : vector<8x128xf32>, i32 -> vector<8x128xf32>
    %c119_i32 = arith.constant 119 : i32
    %24 = tpu.dynamic_rotate %16 by %c119_i32 dim 1 : vector<8x128xf32>, i32 -> vector<8x128xf32>
    %25 = tpu.concatenate %17, %18, %19, %20, %16, %21, %22, %23, %24 in 0 : vector<8x128xf32>, vector<8x128xf32>, vector<8x128xf32>, vector<8x128xf32>, vector<8x128xf32>, vector<8x128xf32>, vector<8x128xf32>, vector<8x128xf32>, vector<8x128xf32> -> vector<72x128xf32>
    %26 = arith.truncf %25 : vector<72x128xf32> to vector<72x128xbf16>
    %cst_14 = arith.constant dense<0.000000e+00> : vector<8x128xf32>
    %27 = tpu.matmul %14, %26, %cst_14 {dimension_numbers = #tpu.dot_dimension_numbers<[1], [0], [0], [1], [0, 0, 1, 1], [], []>} : vector<8x72xbf16>, vector<72x128xbf16>, vector<8x128xf32> -> vector<8x128xf32>
    %28 = vector.broadcast %3 : vector<8x1xf32> to vector<8x128xf32>
    %29 = arith.addf %27, %28 : vector<8x128xf32>
    %cst_15 = arith.constant 0.000000e+00 : f32
    %30 = vector.broadcast %cst_15 : f32 to vector<8x128xf32>
    %31 = arith.maximumf %29, %30 : vector<8x128xf32>
    %c0_16 = arith.constant 0 : index
    %c0_17 = arith.constant 0 : index
    %c0_18 = arith.constant 0 : index
    %32 = vector.load %arg5[%c0_16, %c0_17, %c0_18] : memref<2x32x8xbf16, #tpu.memory_space<vmem>>, vector<1x32x8xbf16>
    %33 = vector.shape_cast %32 : vector<1x32x8xbf16> to vector<32x8xbf16>
    %34 = arith.truncf %31 : vector<8x128xf32> to vector<8x128xbf16>
    %cst_19 = arith.constant dense<0.000000e+00> : vector<32x128xf32>
    %35 = tpu.matmul %33, %34, %cst_19 {dimension_numbers = #tpu.dot_dimension_numbers<[1], [0], [0], [1], [0, 0, 1, 1], [], []>} : vector<32x8xbf16>, vector<8x128xbf16>, vector<32x128xf32> -> vector<32x128xf32>
    %36 = vector.broadcast %4 : vector<32x1xf32> to vector<32x128xf32>
    %37 = arith.addf %35, %36 : vector<32x128xf32>
    %38 = arith.addf %37, %1 : vector<32x128xf32>
    %c0_20 = arith.constant 0 : index
    %c3 = arith.constant 3 : index
    %39 = vector.load %arg7[%c0_20, %c3] : memref<32x8xf32, #tpu.memory_space<vmem>>, vector<8x1xf32>
    %c0_21 = arith.constant 0 : index
    %c4 = arith.constant 4 : index
    %40 = vector.load %arg7[%c0_21, %c4] : memref<32x8xf32, #tpu.memory_space<vmem>>, vector<8x1xf32>
    %c0_22 = arith.constant 0 : index
    %c5 = arith.constant 5 : index
    %41 = vector.load %arg7[%c0_22, %c5] : memref<32x8xf32, #tpu.memory_space<vmem>>, vector<32x1xf32>
    %c1_23 = arith.constant 1 : index
    %c0_24 = arith.constant 0 : index
    %c0_25 = arith.constant 0 : index
    %42 = vector.load %arg3[%c1_23, %c0_24, %c0_25] : memref<2x8x32xbf16, #tpu.memory_space<vmem>>, vector<1x8x32xbf16>
    %43 = vector.shape_cast %42 : vector<1x8x32xbf16> to vector<8x32xbf16>
    %44 = arith.truncf %38 : vector<32x128xf32> to vector<32x128xbf16>
    %cst_26 = arith.constant dense<0.000000e+00> : vector<8x128xf32>
    %45 = tpu.matmul %43, %44, %cst_26 {dimension_numbers = #tpu.dot_dimension_numbers<[1], [0], [0], [1], [0, 0, 1, 1], [], []>} : vector<8x32xbf16>, vector<32x128xbf16>, vector<8x128xf32> -> vector<8x128xf32>
    %46 = vector.broadcast %39 : vector<8x1xf32> to vector<8x128xf32>
    %47 = arith.addf %45, %46 : vector<8x128xf32>
    %cst_27 = arith.constant 0.000000e+00 : f32
    %48 = vector.broadcast %cst_27 : f32 to vector<8x128xf32>
    %49 = arith.maximumf %47, %48 : vector<8x128xf32>
    %c1_28 = arith.constant 1 : index
    %c0_29 = arith.constant 0 : index
    %c0_30 = arith.constant 0 : index
    %50 = vector.load %arg4[%c1_28, %c0_29, %c0_30] : memref<2x8x72xbf16, #tpu.memory_space<vmem>>, vector<1x8x72xbf16>
    %51 = vector.shape_cast %50 : vector<1x8x72xbf16> to vector<8x72xbf16>
    %52 = vector.broadcast %0 : vector<1x128xf32> to vector<8x128xf32>
    %53 = arith.mulf %49, %52 : vector<8x128xf32>
    %c9_i32_31 = arith.constant 9 : i32
    %54 = tpu.dynamic_rotate %53 by %c9_i32_31 dim 1 : vector<8x128xf32>, i32 -> vector<8x128xf32>
    %c8_i32_32 = arith.constant 8 : i32
    %55 = tpu.dynamic_rotate %53 by %c8_i32_32 dim 1 : vector<8x128xf32>, i32 -> vector<8x128xf32>
    %c7_i32_33 = arith.constant 7 : i32
    %56 = tpu.dynamic_rotate %53 by %c7_i32_33 dim 1 : vector<8x128xf32>, i32 -> vector<8x128xf32>
    %c1_i32_34 = arith.constant 1 : i32
    %57 = tpu.dynamic_rotate %53 by %c1_i32_34 dim 1 : vector<8x128xf32>, i32 -> vector<8x128xf32>
    %c127_i32_35 = arith.constant 127 : i32
    %58 = tpu.dynamic_rotate %53 by %c127_i32_35 dim 1 : vector<8x128xf32>, i32 -> vector<8x128xf32>
    %c121_i32_36 = arith.constant 121 : i32
    %59 = tpu.dynamic_rotate %53 by %c121_i32_36 dim 1 : vector<8x128xf32>, i32 -> vector<8x128xf32>
    %c120_i32_37 = arith.constant 120 : i32
    %60 = tpu.dynamic_rotate %53 by %c120_i32_37 dim 1 : vector<8x128xf32>, i32 -> vector<8x128xf32>
    %c119_i32_38 = arith.constant 119 : i32
    %61 = tpu.dynamic_rotate %53 by %c119_i32_38 dim 1 : vector<8x128xf32>, i32 -> vector<8x128xf32>
    %62 = tpu.concatenate %54, %55, %56, %57, %53, %58, %59, %60, %61 in 0 : vector<8x128xf32>, vector<8x128xf32>, vector<8x128xf32>, vector<8x128xf32>, vector<8x128xf32>, vector<8x128xf32>, vector<8x128xf32>, vector<8x128xf32>, vector<8x128xf32> -> vector<72x128xf32>
    %63 = arith.truncf %62 : vector<72x128xf32> to vector<72x128xbf16>
    %cst_39 = arith.constant dense<0.000000e+00> : vector<8x128xf32>
    %64 = tpu.matmul %51, %63, %cst_39 {dimension_numbers = #tpu.dot_dimension_numbers<[1], [0], [0], [1], [0, 0, 1, 1], [], []>} : vector<8x72xbf16>, vector<72x128xbf16>, vector<8x128xf32> -> vector<8x128xf32>
    %65 = vector.broadcast %40 : vector<8x1xf32> to vector<8x128xf32>
    %66 = arith.addf %64, %65 : vector<8x128xf32>
    %cst_40 = arith.constant 0.000000e+00 : f32
    %67 = vector.broadcast %cst_40 : f32 to vector<8x128xf32>
    %68 = arith.maximumf %66, %67 : vector<8x128xf32>
    %c1_41 = arith.constant 1 : index
    %c0_42 = arith.constant 0 : index
    %c0_43 = arith.constant 0 : index
    %69 = vector.load %arg5[%c1_41, %c0_42, %c0_43] : memref<2x32x8xbf16, #tpu.memory_space<vmem>>, vector<1x32x8xbf16>
    %70 = vector.shape_cast %69 : vector<1x32x8xbf16> to vector<32x8xbf16>
    %71 = arith.truncf %68 : vector<8x128xf32> to vector<8x128xbf16>
    %cst_44 = arith.constant dense<0.000000e+00> : vector<32x128xf32>
    %72 = tpu.matmul %70, %71, %cst_44 {dimension_numbers = #tpu.dot_dimension_numbers<[1], [0], [0], [1], [0, 0, 1, 1], [], []>} : vector<32x8xbf16>, vector<8x128xbf16>, vector<32x128xf32> -> vector<32x128xf32>
    %73 = vector.broadcast %41 : vector<32x1xf32> to vector<32x128xf32>
    %74 = arith.addf %72, %73 : vector<32x128xf32>
    %75 = arith.addf %74, %38 : vector<32x128xf32>
    %76 = vector.extract_strided_slice %75 {offsets = [0, 0], sizes = [1, 64], strides = [1, 1]} : vector<32x128xf32> to vector<1x64xf32>
    %c0_45 = arith.constant 0 : index
    %c0_46 = arith.constant 0 : index
    %77 = vector.load %arg10[%c0_45, %c0_46] : memref<2x2048xf32, #tpu.memory_space<vmem>>, vector<1x64xf32>
    tpu.vector_store %arg10[%c0_45, %c0_46], %76 {strides = array<i32>} : memref<2x2048xf32, #tpu.memory_space<vmem>>, vector<1x64xf32>,
    %78 = vector.extract_strided_slice %75 {offsets = [1, 0], sizes = [1, 64], strides = [1, 1]} : vector<32x128xf32> to vector<1x64xf32>
    %c0_47 = arith.constant 0 : index
    %c64 = arith.constant 64 : index
    %79 = vector.load %arg10[%c0_47, %c64] : memref<2x2048xf32, #tpu.memory_space<vmem>>, vector<1x64xf32>
    tpu.vector_store %arg10[%c0_47, %c64], %78 {strides = array<i32>} : memref<2x2048xf32, #tpu.memory_space<vmem>>, vector<1x64xf32>,
    %80 = vector.extract_strided_slice %75 {offsets = [2, 0], sizes = [1, 64], strides = [1, 1]} : vector<32x128xf32> to vector<1x64xf32>
    %c0_48 = arith.constant 0 : index
    %c128 = arith.constant 128 : index
    %81 = vector.load %arg10[%c0_48, %c128] : memref<2x2048xf32, #tpu.memory_space<vmem>>, vector<1x64xf32>
    tpu.vector_store %arg10[%c0_48, %c128], %80 {strides = array<i32>} : memref<2x2048xf32, #tpu.memory_space<vmem>>, vector<1x64xf32>,
    %82 = vector.extract_strided_slice %75 {offsets = [3, 0], sizes = [1, 64], strides = [1, 1]} : vector<32x128xf32> to vector<1x64xf32>
    %c0_49 = arith.constant 0 : index
    %c192 = arith.constant 192 : index
    %83 = vector.load %arg10[%c0_49, %c192] : memref<2x2048xf32, #tpu.memory_space<vmem>>, vector<1x64xf32>
    tpu.vector_store %arg10[%c0_49, %c192], %82 {strides = array<i32>} : memref<2x2048xf32, #tpu.memory_space<vmem>>, vector<1x64xf32>,
    %84 = vector.extract_strided_slice %75 {offsets = [4, 0], sizes = [1, 64], strides = [1, 1]} : vector<32x128xf32> to vector<1x64xf32>
    %c0_50 = arith.constant 0 : index
    %c256 = arith.constant 256 : index
    %85 = vector.load %arg10[%c0_50, %c256] : memref<2x2048xf32, #tpu.memory_space<vmem>>, vector<1x64xf32>
    tpu.vector_store %arg10[%c0_50, %c256], %84 {strides = array<i32>} : memref<2x2048xf32, #tpu.memory_space<vmem>>, vector<1x64xf32>,
    %86 = vector.extract_strided_slice %75 {offsets = [5, 0], sizes = [1, 64], strides = [1, 1]} : vector<32x128xf32> to vector<1x64xf32>
    %c0_51 = arith.constant 0 : index
    %c320 = arith.constant 320 : index
    %87 = vector.load %arg10[%c0_51, %c320] : memref<2x2048xf32, #tpu.memory_space<vmem>>, vector<1x64xf32>
    tpu.vector_store %arg10[%c0_51, %c320], %86 {strides = array<i32>} : memref<2x2048xf32, #tpu.memory_space<vmem>>, vector<1x64xf32>,
    %88 = vector.extract_strided_slice %75 {offsets = [6, 0], sizes = [1, 64], strides = [1, 1]} : vector<32x128xf32> to vector<1x64xf32>
    %c0_52 = arith.constant 0 : index
    %c384 = arith.constant 384 : index
    %89 = vector.load %arg10[%c0_52, %c384] : memref<2x2048xf32, #tpu.memory_space<vmem>>, vector<1x64xf32>
    tpu.vector_store %arg10[%c0_52, %c384], %88 {strides = array<i32>} : memref<2x2048xf32, #tpu.memory_space<vmem>>, vector<1x64xf32>,
    %90 = vector.extract_strided_slice %75 {offsets = [7, 0], sizes = [1, 64], strides = [1, 1]} : vector<32x128xf32> to vector<1x64xf32>
    %c0_53 = arith.constant 0 : index
    %c448 = arith.constant 448 : index
    %91 = vector.load %arg10[%c0_53, %c448] : memref<2x2048xf32, #tpu.memory_space<vmem>>, vector<1x64xf32>
    tpu.vector_store %arg10[%c0_53, %c448], %90 {strides = array<i32>} : memref<2x2048xf32, #tpu.memory_space<vmem>>, vector<1x64xf32>,
    %92 = vector.extract_strided_slice %75 {offsets = [8, 0], sizes = [1, 64], strides = [1, 1]} : vector<32x128xf32> to vector<1x64xf32>
    %c0_54 = arith.constant 0 : index
    %c512 = arith.constant 512 : index
    %93 = vector.load %arg10[%c0_54, %c512] : memref<2x2048xf32, #tpu.memory_space<vmem>>, vector<1x64xf32>
    tpu.vector_store %arg10[%c0_54, %c512], %92 {strides = array<i32>} : memref<2x2048xf32, #tpu.memory_space<vmem>>, vector<1x64xf32>,
    %94 = vector.extract_strided_slice %75 {offsets = [9, 0], sizes = [1, 64], strides = [1, 1]} : vector<32x128xf32> to vector<1x64xf32>
    %c0_55 = arith.constant 0 : index
    %c576 = arith.constant 576 : index
    %95 = vector.load %arg10[%c0_55, %c576] : memref<2x2048xf32, #tpu.memory_space<vmem>>, vector<1x64xf32>
    tpu.vector_store %arg10[%c0_55, %c576], %94 {strides = array<i32>} : memref<2x2048xf32, #tpu.memory_space<vmem>>, vector<1x64xf32>,
    %96 = vector.extract_strided_slice %75 {offsets = [10, 0], sizes = [1, 64], strides = [1, 1]} : vector<32x128xf32> to vector<1x64xf32>
    %c0_56 = arith.constant 0 : index
    %c640 = arith.constant 640 : index
    %97 = vector.load %arg10[%c0_56, %c640] : memref<2x2048xf32, #tpu.memory_space<vmem>>, vector<1x64xf32>
    tpu.vector_store %arg10[%c0_56, %c640], %96 {strides = array<i32>} : memref<2x2048xf32, #tpu.memory_space<vmem>>, vector<1x64xf32>,
    %98 = vector.extract_strided_slice %75 {offsets = [11, 0], sizes = [1, 64], strides = [1, 1]} : vector<32x128xf32> to vector<1x64xf32>
    %c0_57 = arith.constant 0 : index
    %c704 = arith.constant 704 : index
    %99 = vector.load %arg10[%c0_57, %c704] : memref<2x2048xf32, #tpu.memory_space<vmem>>, vector<1x64xf32>
    tpu.vector_store %arg10[%c0_57, %c704], %98 {strides = array<i32>} : memref<2x2048xf32, #tpu.memory_space<vmem>>, vector<1x64xf32>,
    %100 = vector.extract_strided_slice %75 {offsets = [12, 0], sizes = [1, 64], strides = [1, 1]} : vector<32x128xf32> to vector<1x64xf32>
    %c0_58 = arith.constant 0 : index
    %c768 = arith.constant 768 : index
    %101 = vector.load %arg10[%c0_58, %c768] : memref<2x2048xf32, #tpu.memory_space<vmem>>, vector<1x64xf32>
    tpu.vector_store %arg10[%c0_58, %c768], %100 {strides = array<i32>} : memref<2x2048xf32, #tpu.memory_space<vmem>>, vector<1x64xf32>,
    %102 = vector.extract_strided_slice %75 {offsets = [13, 0], sizes = [1, 64], strides = [1, 1]} : vector<32x128xf32> to vector<1x64xf32>
    %c0_59 = arith.constant 0 : index
    %c832 = arith.constant 832 : index
    %103 = vector.load %arg10[%c0_59, %c832] : memref<2x2048xf32, #tpu.memory_space<vmem>>, vector<1x64xf32>
    tpu.vector_store %arg10[%c0_59, %c832], %102 {strides = array<i32>} : memref<2x2048xf32, #tpu.memory_space<vmem>>, vector<1x64xf32>,
    %104 = vector.extract_strided_slice %75 {offsets = [14, 0], sizes = [1, 64], strides = [1, 1]} : vector<32x128xf32> to vector<1x64xf32>
    %c0_60 = arith.constant 0 : index
    %c896 = arith.constant 896 : index
    %105 = vector.load %arg10[%c0_60, %c896] : memref<2x2048xf32, #tpu.memory_space<vmem>>, vector<1x64xf32>
    tpu.vector_store %arg10[%c0_60, %c896], %104 {strides = array<i32>} : memref<2x2048xf32, #tpu.memory_space<vmem>>, vector<1x64xf32>,
    %106 = vector.extract_strided_slice %75 {offsets = [15, 0], sizes = [1, 64], strides = [1, 1]} : vector<32x128xf32> to vector<1x64xf32>
    %c0_61 = arith.constant 0 : index
    %c960 = arith.constant 960 : index
    %107 = vector.load %arg10[%c0_61, %c960] : memref<2x2048xf32, #tpu.memory_space<vmem>>, vector<1x64xf32>
    tpu.vector_store %arg10[%c0_61, %c960], %106 {strides = array<i32>} : memref<2x2048xf32, #tpu.memory_space<vmem>>, vector<1x64xf32>,
    %108 = vector.extract_strided_slice %75 {offsets = [16, 0], sizes = [1, 64], strides = [1, 1]} : vector<32x128xf32> to vector<1x64xf32>
    %c0_62 = arith.constant 0 : index
    %c1024 = arith.constant 1024 : index
    %109 = vector.load %arg10[%c0_62, %c1024] : memref<2x2048xf32, #tpu.memory_space<vmem>>, vector<1x64xf32>
    tpu.vector_store %arg10[%c0_62, %c1024], %108 {strides = array<i32>} : memref<2x2048xf32, #tpu.memory_space<vmem>>, vector<1x64xf32>,
    %110 = vector.extract_strided_slice %75 {offsets = [17, 0], sizes = [1, 64], strides = [1, 1]} : vector<32x128xf32> to vector<1x64xf32>
    %c0_63 = arith.constant 0 : index
    %c1088 = arith.constant 1088 : index
    %111 = vector.load %arg10[%c0_63, %c1088] : memref<2x2048xf32, #tpu.memory_space<vmem>>, vector<1x64xf32>
    tpu.vector_store %arg10[%c0_63, %c1088], %110 {strides = array<i32>} : memref<2x2048xf32, #tpu.memory_space<vmem>>, vector<1x64xf32>,
    %112 = vector.extract_strided_slice %75 {offsets = [18, 0], sizes = [1, 64], strides = [1, 1]} : vector<32x128xf32> to vector<1x64xf32>
    %c0_64 = arith.constant 0 : index
    %c1152 = arith.constant 1152 : index
    %113 = vector.load %arg10[%c0_64, %c1152] : memref<2x2048xf32, #tpu.memory_space<vmem>>, vector<1x64xf32>
    tpu.vector_store %arg10[%c0_64, %c1152], %112 {strides = array<i32>} : memref<2x2048xf32, #tpu.memory_space<vmem>>, vector<1x64xf32>,
    %114 = vector.extract_strided_slice %75 {offsets = [19, 0], sizes = [1, 64], strides = [1, 1]} : vector<32x128xf32> to vector<1x64xf32>
    %c0_65 = arith.constant 0 : index
    %c1216 = arith.constant 1216 : index
    %115 = vector.load %arg10[%c0_65, %c1216] : memref<2x2048xf32, #tpu.memory_space<vmem>>, vector<1x64xf32>
    tpu.vector_store %arg10[%c0_65, %c1216], %114 {strides = array<i32>} : memref<2x2048xf32, #tpu.memory_space<vmem>>, vector<1x64xf32>,
    %116 = vector.extract_strided_slice %75 {offsets = [20, 0], sizes = [1, 64], strides = [1, 1]} : vector<32x128xf32> to vector<1x64xf32>
    %c0_66 = arith.constant 0 : index
    %c1280 = arith.constant 1280 : index
    %117 = vector.load %arg10[%c0_66, %c1280] : memref<2x2048xf32, #tpu.memory_space<vmem>>, vector<1x64xf32>
    tpu.vector_store %arg10[%c0_66, %c1280], %116 {strides = array<i32>} : memref<2x2048xf32, #tpu.memory_space<vmem>>, vector<1x64xf32>,
    %118 = vector.extract_strided_slice %75 {offsets = [21, 0], sizes = [1, 64], strides = [1, 1]} : vector<32x128xf32> to vector<1x64xf32>
    %c0_67 = arith.constant 0 : index
    %c1344 = arith.constant 1344 : index
    %119 = vector.load %arg10[%c0_67, %c1344] : memref<2x2048xf32, #tpu.memory_space<vmem>>, vector<1x64xf32>
    tpu.vector_store %arg10[%c0_67, %c1344], %118 {strides = array<i32>} : memref<2x2048xf32, #tpu.memory_space<vmem>>, vector<1x64xf32>,
    %120 = vector.extract_strided_slice %75 {offsets = [22, 0], sizes = [1, 64], strides = [1, 1]} : vector<32x128xf32> to vector<1x64xf32>
    %c0_68 = arith.constant 0 : index
    %c1408 = arith.constant 1408 : index
    %121 = vector.load %arg10[%c0_68, %c1408] : memref<2x2048xf32, #tpu.memory_space<vmem>>, vector<1x64xf32>
    tpu.vector_store %arg10[%c0_68, %c1408], %120 {strides = array<i32>} : memref<2x2048xf32, #tpu.memory_space<vmem>>, vector<1x64xf32>,
    %122 = vector.extract_strided_slice %75 {offsets = [23, 0], sizes = [1, 64], strides = [1, 1]} : vector<32x128xf32> to vector<1x64xf32>
    %c0_69 = arith.constant 0 : index
    %c1472 = arith.constant 1472 : index
    %123 = vector.load %arg10[%c0_69, %c1472] : memref<2x2048xf32, #tpu.memory_space<vmem>>, vector<1x64xf32>
    tpu.vector_store %arg10[%c0_69, %c1472], %122 {strides = array<i32>} : memref<2x2048xf32, #tpu.memory_space<vmem>>, vector<1x64xf32>,
    %124 = vector.extract_strided_slice %75 {offsets = [24, 0], sizes = [1, 64], strides = [1, 1]} : vector<32x128xf32> to vector<1x64xf32>
    %c0_70 = arith.constant 0 : index
    %c1536 = arith.constant 1536 : index
    %125 = vector.load %arg10[%c0_70, %c1536] : memref<2x2048xf32, #tpu.memory_space<vmem>>, vector<1x64xf32>
    tpu.vector_store %arg10[%c0_70, %c1536], %124 {strides = array<i32>} : memref<2x2048xf32, #tpu.memory_space<vmem>>, vector<1x64xf32>,
    %126 = vector.extract_strided_slice %75 {offsets = [25, 0], sizes = [1, 64], strides = [1, 1]} : vector<32x128xf32> to vector<1x64xf32>
    %c0_71 = arith.constant 0 : index
    %c1600 = arith.constant 1600 : index
    %127 = vector.load %arg10[%c0_71, %c1600] : memref<2x2048xf32, #tpu.memory_space<vmem>>, vector<1x64xf32>
    tpu.vector_store %arg10[%c0_71, %c1600], %126 {strides = array<i32>} : memref<2x2048xf32, #tpu.memory_space<vmem>>, vector<1x64xf32>,
    %128 = vector.extract_strided_slice %75 {offsets = [26, 0], sizes = [1, 64], strides = [1, 1]} : vector<32x128xf32> to vector<1x64xf32>
    %c0_72 = arith.constant 0 : index
    %c1664 = arith.constant 1664 : index
    %129 = vector.load %arg10[%c0_72, %c1664] : memref<2x2048xf32, #tpu.memory_space<vmem>>, vector<1x64xf32>
    tpu.vector_store %arg10[%c0_72, %c1664], %128 {strides = array<i32>} : memref<2x2048xf32, #tpu.memory_space<vmem>>, vector<1x64xf32>,
    %130 = vector.extract_strided_slice %75 {offsets = [27, 0], sizes = [1, 64], strides = [1, 1]} : vector<32x128xf32> to vector<1x64xf32>
    %c0_73 = arith.constant 0 : index
    %c1728 = arith.constant 1728 : index
    %131 = vector.load %arg10[%c0_73, %c1728] : memref<2x2048xf32, #tpu.memory_space<vmem>>, vector<1x64xf32>
    tpu.vector_store %arg10[%c0_73, %c1728], %130 {strides = array<i32>} : memref<2x2048xf32, #tpu.memory_space<vmem>>, vector<1x64xf32>,
    %132 = vector.extract_strided_slice %75 {offsets = [28, 0], sizes = [1, 64], strides = [1, 1]} : vector<32x128xf32> to vector<1x64xf32>
    %c0_74 = arith.constant 0 : index
    %c1792 = arith.constant 1792 : index
    %133 = vector.load %arg10[%c0_74, %c1792] : memref<2x2048xf32, #tpu.memory_space<vmem>>, vector<1x64xf32>
    tpu.vector_store %arg10[%c0_74, %c1792], %132 {strides = array<i32>} : memref<2x2048xf32, #tpu.memory_space<vmem>>, vector<1x64xf32>,
    %134 = vector.extract_strided_slice %75 {offsets = [29, 0], sizes = [1, 64], strides = [1, 1]} : vector<32x128xf32> to vector<1x64xf32>
    %c0_75 = arith.constant 0 : index
    %c1856 = arith.constant 1856 : index
    %135 = vector.load %arg10[%c0_75, %c1856] : memref<2x2048xf32, #tpu.memory_space<vmem>>, vector<1x64xf32>
    tpu.vector_store %arg10[%c0_75, %c1856], %134 {strides = array<i32>} : memref<2x2048xf32, #tpu.memory_space<vmem>>, vector<1x64xf32>,
    %136 = vector.extract_strided_slice %75 {offsets = [30, 0], sizes = [1, 64], strides = [1, 1]} : vector<32x128xf32> to vector<1x64xf32>
    %c0_76 = arith.constant 0 : index
    %c1920 = arith.constant 1920 : index
    %137 = vector.load %arg10[%c0_76, %c1920] : memref<2x2048xf32, #tpu.memory_space<vmem>>, vector<1x64xf32>
    tpu.vector_store %arg10[%c0_76, %c1920], %136 {strides = array<i32>} : memref<2x2048xf32, #tpu.memory_space<vmem>>, vector<1x64xf32>,
    %138 = vector.extract_strided_slice %75 {offsets = [31, 0], sizes = [1, 64], strides = [1, 1]} : vector<32x128xf32> to vector<1x64xf32>
    %c0_77 = arith.constant 0 : index
    %c1984 = arith.constant 1984 : index
    %139 = vector.load %arg10[%c0_77, %c1984] : memref<2x2048xf32, #tpu.memory_space<vmem>>, vector<1x64xf32>
    tpu.vector_store %arg10[%c0_77, %c1984], %138 {strides = array<i32>} : memref<2x2048xf32, #tpu.memory_space<vmem>>, vector<1x64xf32>,
    %140 = vector.extract_strided_slice %75 {offsets = [0, 64], sizes = [1, 64], strides = [1, 1]} : vector<32x128xf32> to vector<1x64xf32>
    %c1_78 = arith.constant 1 : index
    %c0_79 = arith.constant 0 : index
    %141 = vector.load %arg10[%c1_78, %c0_79] : memref<2x2048xf32, #tpu.memory_space<vmem>>, vector<1x64xf32>
    tpu.vector_store %arg10[%c1_78, %c0_79], %140 {strides = array<i32>} : memref<2x2048xf32, #tpu.memory_space<vmem>>, vector<1x64xf32>,
    %142 = vector.extract_strided_slice %75 {offsets = [1, 64], sizes = [1, 64], strides = [1, 1]} : vector<32x128xf32> to vector<1x64xf32>
    %c1_80 = arith.constant 1 : index
    %c64_81 = arith.constant 64 : index
    %143 = vector.load %arg10[%c1_80, %c64_81] : memref<2x2048xf32, #tpu.memory_space<vmem>>, vector<1x64xf32>
    tpu.vector_store %arg10[%c1_80, %c64_81], %142 {strides = array<i32>} : memref<2x2048xf32, #tpu.memory_space<vmem>>, vector<1x64xf32>,
    %144 = vector.extract_strided_slice %75 {offsets = [2, 64], sizes = [1, 64], strides = [1, 1]} : vector<32x128xf32> to vector<1x64xf32>
    %c1_82 = arith.constant 1 : index
    %c128_83 = arith.constant 128 : index
    %145 = vector.load %arg10[%c1_82, %c128_83] : memref<2x2048xf32, #tpu.memory_space<vmem>>, vector<1x64xf32>
    tpu.vector_store %arg10[%c1_82, %c128_83], %144 {strides = array<i32>} : memref<2x2048xf32, #tpu.memory_space<vmem>>, vector<1x64xf32>,
    %146 = vector.extract_strided_slice %75 {offsets = [3, 64], sizes = [1, 64], strides = [1, 1]} : vector<32x128xf32> to vector<1x64xf32>
    %c1_84 = arith.constant 1 : index
    %c192_85 = arith.constant 192 : index
    %147 = vector.load %arg10[%c1_84, %c192_85] : memref<2x2048xf32, #tpu.memory_space<vmem>>, vector<1x64xf32>
    tpu.vector_store %arg10[%c1_84, %c192_85], %146 {strides = array<i32>} : memref<2x2048xf32, #tpu.memory_space<vmem>>, vector<1x64xf32>,
    %148 = vector.extract_strided_slice %75 {offsets = [4, 64], sizes = [1, 64], strides = [1, 1]} : vector<32x128xf32> to vector<1x64xf32>
    %c1_86 = arith.constant 1 : index
    %c256_87 = arith.constant 256 : index
    %149 = vector.load %arg10[%c1_86, %c256_87] : memref<2x2048xf32, #tpu.memory_space<vmem>>, vector<1x64xf32>
    tpu.vector_store %arg10[%c1_86, %c256_87], %148 {strides = array<i32>} : memref<2x2048xf32, #tpu.memory_space<vmem>>, vector<1x64xf32>,
    %150 = vector.extract_strided_slice %75 {offsets = [5, 64], sizes = [1, 64], strides = [1, 1]} : vector<32x128xf32> to vector<1x64xf32>
    %c1_88 = arith.constant 1 : index
    %c320_89 = arith.constant 320 : index
    %151 = vector.load %arg10[%c1_88, %c320_89] : memref<2x2048xf32, #tpu.memory_space<vmem>>, vector<1x64xf32>
    tpu.vector_store %arg10[%c1_88, %c320_89], %150 {strides = array<i32>} : memref<2x2048xf32, #tpu.memory_space<vmem>>, vector<1x64xf32>,
    %152 = vector.extract_strided_slice %75 {offsets = [6, 64], sizes = [1, 64], strides = [1, 1]} : vector<32x128xf32> to vector<1x64xf32>
    %c1_90 = arith.constant 1 : index
    %c384_91 = arith.constant 384 : index
    %153 = vector.load %arg10[%c1_90, %c384_91] : memref<2x2048xf32, #tpu.memory_space<vmem>>, vector<1x64xf32>
    tpu.vector_store %arg10[%c1_90, %c384_91], %152 {strides = array<i32>} : memref<2x2048xf32, #tpu.memory_space<vmem>>, vector<1x64xf32>,
    %154 = vector.extract_strided_slice %75 {offsets = [7, 64], sizes = [1, 64], strides = [1, 1]} : vector<32x128xf32> to vector<1x64xf32>
    %c1_92 = arith.constant 1 : index
    %c448_93 = arith.constant 448 : index
    %155 = vector.load %arg10[%c1_92, %c448_93] : memref<2x2048xf32, #tpu.memory_space<vmem>>, vector<1x64xf32>
    tpu.vector_store %arg10[%c1_92, %c448_93], %154 {strides = array<i32>} : memref<2x2048xf32, #tpu.memory_space<vmem>>, vector<1x64xf32>,
    %156 = vector.extract_strided_slice %75 {offsets = [8, 64], sizes = [1, 64], strides = [1, 1]} : vector<32x128xf32> to vector<1x64xf32>
    %c1_94 = arith.constant 1 : index
    %c512_95 = arith.constant 512 : index
    %157 = vector.load %arg10[%c1_94, %c512_95] : memref<2x2048xf32, #tpu.memory_space<vmem>>, vector<1x64xf32>
    tpu.vector_store %arg10[%c1_94, %c512_95], %156 {strides = array<i32>} : memref<2x2048xf32, #tpu.memory_space<vmem>>, vector<1x64xf32>,
    %158 = vector.extract_strided_slice %75 {offsets = [9, 64], sizes = [1, 64], strides = [1, 1]} : vector<32x128xf32> to vector<1x64xf32>
    %c1_96 = arith.constant 1 : index
    %c576_97 = arith.constant 576 : index
    %159 = vector.load %arg10[%c1_96, %c576_97] : memref<2x2048xf32, #tpu.memory_space<vmem>>, vector<1x64xf32>
    tpu.vector_store %arg10[%c1_96, %c576_97], %158 {strides = array<i32>} : memref<2x2048xf32, #tpu.memory_space<vmem>>, vector<1x64xf32>,
    %160 = vector.extract_strided_slice %75 {offsets = [10, 64], sizes = [1, 64], strides = [1, 1]} : vector<32x128xf32> to vector<1x64xf32>
    %c1_98 = arith.constant 1 : index
    %c640_99 = arith.constant 640 : index
    %161 = vector.load %arg10[%c1_98, %c640_99] : memref<2x2048xf32, #tpu.memory_space<vmem>>, vector<1x64xf32>
    tpu.vector_store %arg10[%c1_98, %c640_99], %160 {strides = array<i32>} : memref<2x2048xf32, #tpu.memory_space<vmem>>, vector<1x64xf32>,
    %162 = vector.extract_strided_slice %75 {offsets = [11, 64], sizes = [1, 64], strides = [1, 1]} : vector<32x128xf32> to vector<1x64xf32>
    %c1_100 = arith.constant 1 : index
    %c704_101 = arith.constant 704 : index
    %163 = vector.load %arg10[%c1_100, %c704_101] : memref<2x2048xf32, #tpu.memory_space<vmem>>, vector<1x64xf32>
    tpu.vector_store %arg10[%c1_100, %c704_101], %162 {strides = array<i32>} : memref<2x2048xf32, #tpu.memory_space<vmem>>, vector<1x64xf32>,
    %164 = vector.extract_strided_slice %75 {offsets = [12, 64], sizes = [1, 64], strides = [1, 1]} : vector<32x128xf32> to vector<1x64xf32>
    %c1_102 = arith.constant 1 : index
    %c768_103 = arith.constant 768 : index
    %165 = vector.load %arg10[%c1_102, %c768_103] : memref<2x2048xf32, #tpu.memory_space<vmem>>, vector<1x64xf32>
    tpu.vector_store %arg10[%c1_102, %c768_103], %164 {strides = array<i32>} : memref<2x2048xf32, #tpu.memory_space<vmem>>, vector<1x64xf32>,
    %166 = vector.extract_strided_slice %75 {offsets = [13, 64], sizes = [1, 64], strides = [1, 1]} : vector<32x128xf32> to vector<1x64xf32>
    %c1_104 = arith.constant 1 : index
    %c832_105 = arith.constant 832 : index
    %167 = vector.load %arg10[%c1_104, %c832_105] : memref<2x2048xf32, #tpu.memory_space<vmem>>, vector<1x64xf32>
    tpu.vector_store %arg10[%c1_104, %c832_105], %166 {strides = array<i32>} : memref<2x2048xf32, #tpu.memory_space<vmem>>, vector<1x64xf32>,
    %168 = vector.extract_strided_slice %75 {offsets = [14, 64], sizes = [1, 64], strides = [1, 1]} : vector<32x128xf32> to vector<1x64xf32>
    %c1_106 = arith.constant 1 : index
    %c896_107 = arith.constant 896 : index
    %169 = vector.load %arg10[%c1_106, %c896_107] : memref<2x2048xf32, #tpu.memory_space<vmem>>, vector<1x64xf32>
    tpu.vector_store %arg10[%c1_106, %c896_107], %168 {strides = array<i32>} : memref<2x2048xf32, #tpu.memory_space<vmem>>, vector<1x64xf32>,
    %170 = vector.extract_strided_slice %75 {offsets = [15, 64], sizes = [1, 64], strides = [1, 1]} : vector<32x128xf32> to vector<1x64xf32>
    %c1_108 = arith.constant 1 : index
    %c960_109 = arith.constant 960 : index
    %171 = vector.load %arg10[%c1_108, %c960_109] : memref<2x2048xf32, #tpu.memory_space<vmem>>, vector<1x64xf32>
    tpu.vector_store %arg10[%c1_108, %c960_109], %170 {strides = array<i32>} : memref<2x2048xf32, #tpu.memory_space<vmem>>, vector<1x64xf32>,
    %172 = vector.extract_strided_slice %75 {offsets = [16, 64], sizes = [1, 64], strides = [1, 1]} : vector<32x128xf32> to vector<1x64xf32>
    %c1_110 = arith.constant 1 : index
    %c1024_111 = arith.constant 1024 : index
    %173 = vector.load %arg10[%c1_110, %c1024_111] : memref<2x2048xf32, #tpu.memory_space<vmem>>, vector<1x64xf32>
    tpu.vector_store %arg10[%c1_110, %c1024_111], %172 {strides = array<i32>} : memref<2x2048xf32, #tpu.memory_space<vmem>>, vector<1x64xf32>,
    %174 = vector.extract_strided_slice %75 {offsets = [17, 64], sizes = [1, 64], strides = [1, 1]} : vector<32x128xf32> to vector<1x64xf32>
    %c1_112 = arith.constant 1 : index
    %c1088_113 = arith.constant 1088 : index
    %175 = vector.load %arg10[%c1_112, %c1088_113] : memref<2x2048xf32, #tpu.memory_space<vmem>>, vector<1x64xf32>
    tpu.vector_store %arg10[%c1_112, %c1088_113], %174 {strides = array<i32>} : memref<2x2048xf32, #tpu.memory_space<vmem>>, vector<1x64xf32>,
    %176 = vector.extract_strided_slice %75 {offsets = [18, 64], sizes = [1, 64], strides = [1, 1]} : vector<32x128xf32> to vector<1x64xf32>
    %c1_114 = arith.constant 1 : index
    %c1152_115 = arith.constant 1152 : index
    %177 = vector.load %arg10[%c1_114, %c1152_115] : memref<2x2048xf32, #tpu.memory_space<vmem>>, vector<1x64xf32>
    tpu.vector_store %arg10[%c1_114, %c1152_115], %176 {strides = array<i32>} : memref<2x2048xf32, #tpu.memory_space<vmem>>, vector<1x64xf32>,
    %178 = vector.extract_strided_slice %75 {offsets = [19, 64], sizes = [1, 64], strides = [1, 1]} : vector<32x128xf32> to vector<1x64xf32>
    %c1_116 = arith.constant 1 : index
    %c1216_117 = arith.constant 1216 : index
    %179 = vector.load %arg10[%c1_116, %c1216_117] : memref<2x2048xf32, #tpu.memory_space<vmem>>, vector<1x64xf32>
    tpu.vector_store %arg10[%c1_116, %c1216_117], %178 {strides = array<i32>} : memref<2x2048xf32, #tpu.memory_space<vmem>>, vector<1x64xf32>,
    %180 = vector.extract_strided_slice %75 {offsets = [20, 64], sizes = [1, 64], strides = [1, 1]} : vector<32x128xf32> to vector<1x64xf32>
    %c1_118 = arith.constant 1 : index
    %c1280_119 = arith.constant 1280 : index
    %181 = vector.load %arg10[%c1_118, %c1280_119] : memref<2x2048xf32, #tpu.memory_space<vmem>>, vector<1x64xf32>
    tpu.vector_store %arg10[%c1_118, %c1280_119], %180 {strides = array<i32>} : memref<2x2048xf32, #tpu.memory_space<vmem>>, vector<1x64xf32>,
    %182 = vector.extract_strided_slice %75 {offsets = [21, 64], sizes = [1, 64], strides = [1, 1]} : vector<32x128xf32> to vector<1x64xf32>
    %c1_120 = arith.constant 1 : index
    %c1344_121 = arith.constant 1344 : index
    %183 = vector.load %arg10[%c1_120, %c1344_121] : memref<2x2048xf32, #tpu.memory_space<vmem>>, vector<1x64xf32>
    tpu.vector_store %arg10[%c1_120, %c1344_121], %182 {strides = array<i32>} : memref<2x2048xf32, #tpu.memory_space<vmem>>, vector<1x64xf32>,
    %184 = vector.extract_strided_slice %75 {offsets = [22, 64], sizes = [1, 64], strides = [1, 1]} : vector<32x128xf32> to vector<1x64xf32>
    %c1_122 = arith.constant 1 : index
    %c1408_123 = arith.constant 1408 : index
    %185 = vector.load %arg10[%c1_122, %c1408_123] : memref<2x2048xf32, #tpu.memory_space<vmem>>, vector<1x64xf32>
    tpu.vector_store %arg10[%c1_122, %c1408_123], %184 {strides = array<i32>} : memref<2x2048xf32, #tpu.memory_space<vmem>>, vector<1x64xf32>,
    %186 = vector.extract_strided_slice %75 {offsets = [23, 64], sizes = [1, 64], strides = [1, 1]} : vector<32x128xf32> to vector<1x64xf32>
    %c1_124 = arith.constant 1 : index
    %c1472_125 = arith.constant 1472 : index
    %187 = vector.load %arg10[%c1_124, %c1472_125] : memref<2x2048xf32, #tpu.memory_space<vmem>>, vector<1x64xf32>
    tpu.vector_store %arg10[%c1_124, %c1472_125], %186 {strides = array<i32>} : memref<2x2048xf32, #tpu.memory_space<vmem>>, vector<1x64xf32>,
    %188 = vector.extract_strided_slice %75 {offsets = [24, 64], sizes = [1, 64], strides = [1, 1]} : vector<32x128xf32> to vector<1x64xf32>
    %c1_126 = arith.constant 1 : index
    %c1536_127 = arith.constant 1536 : index
    %189 = vector.load %arg10[%c1_126, %c1536_127] : memref<2x2048xf32, #tpu.memory_space<vmem>>, vector<1x64xf32>
    tpu.vector_store %arg10[%c1_126, %c1536_127], %188 {strides = array<i32>} : memref<2x2048xf32, #tpu.memory_space<vmem>>, vector<1x64xf32>,
    %190 = vector.extract_strided_slice %75 {offsets = [25, 64], sizes = [1, 64], strides = [1, 1]} : vector<32x128xf32> to vector<1x64xf32>
    %c1_128 = arith.constant 1 : index
    %c1600_129 = arith.constant 1600 : index
    %191 = vector.load %arg10[%c1_128, %c1600_129] : memref<2x2048xf32, #tpu.memory_space<vmem>>, vector<1x64xf32>
    tpu.vector_store %arg10[%c1_128, %c1600_129], %190 {strides = array<i32>} : memref<2x2048xf32, #tpu.memory_space<vmem>>, vector<1x64xf32>,
    %192 = vector.extract_strided_slice %75 {offsets = [26, 64], sizes = [1, 64], strides = [1, 1]} : vector<32x128xf32> to vector<1x64xf32>
    %c1_130 = arith.constant 1 : index
    %c1664_131 = arith.constant 1664 : index
    %193 = vector.load %arg10[%c1_130, %c1664_131] : memref<2x2048xf32, #tpu.memory_space<vmem>>, vector<1x64xf32>
    tpu.vector_store %arg10[%c1_130, %c1664_131], %192 {strides = array<i32>} : memref<2x2048xf32, #tpu.memory_space<vmem>>, vector<1x64xf32>,
    %194 = vector.extract_strided_slice %75 {offsets = [27, 64], sizes = [1, 64], strides = [1, 1]} : vector<32x128xf32> to vector<1x64xf32>
    %c1_132 = arith.constant 1 : index
    %c1728_133 = arith.constant 1728 : index
    %195 = vector.load %arg10[%c1_132, %c1728_133] : memref<2x2048xf32, #tpu.memory_space<vmem>>, vector<1x64xf32>
    tpu.vector_store %arg10[%c1_132, %c1728_133], %194 {strides = array<i32>} : memref<2x2048xf32, #tpu.memory_space<vmem>>, vector<1x64xf32>,
    %196 = vector.extract_strided_slice %75 {offsets = [28, 64], sizes = [1, 64], strides = [1, 1]} : vector<32x128xf32> to vector<1x64xf32>
    %c1_134 = arith.constant 1 : index
    %c1792_135 = arith.constant 1792 : index
    %197 = vector.load %arg10[%c1_134, %c1792_135] : memref<2x2048xf32, #tpu.memory_space<vmem>>, vector<1x64xf32>
    tpu.vector_store %arg10[%c1_134, %c1792_135], %196 {strides = array<i32>} : memref<2x2048xf32, #tpu.memory_space<vmem>>, vector<1x64xf32>,
    %198 = vector.extract_strided_slice %75 {offsets = [29, 64], sizes = [1, 64], strides = [1, 1]} : vector<32x128xf32> to vector<1x64xf32>
    %c1_136 = arith.constant 1 : index
    %c1856_137 = arith.constant 1856 : index
    %199 = vector.load %arg10[%c1_136, %c1856_137] : memref<2x2048xf32, #tpu.memory_space<vmem>>, vector<1x64xf32>
    tpu.vector_store %arg10[%c1_136, %c1856_137], %198 {strides = array<i32>} : memref<2x2048xf32, #tpu.memory_space<vmem>>, vector<1x64xf32>,
    %200 = vector.extract_strided_slice %75 {offsets = [30, 64], sizes = [1, 64], strides = [1, 1]} : vector<32x128xf32> to vector<1x64xf32>
    %c1_138 = arith.constant 1 : index
    %c1920_139 = arith.constant 1920 : index
    %201 = vector.load %arg10[%c1_138, %c1920_139] : memref<2x2048xf32, #tpu.memory_space<vmem>>, vector<1x64xf32>
    tpu.vector_store %arg10[%c1_138, %c1920_139], %200 {strides = array<i32>} : memref<2x2048xf32, #tpu.memory_space<vmem>>, vector<1x64xf32>,
    %202 = vector.extract_strided_slice %75 {offsets = [31, 64], sizes = [1, 64], strides = [1, 1]} : vector<32x128xf32> to vector<1x64xf32>
    %c1_140 = arith.constant 1 : index
    %c1984_141 = arith.constant 1984 : index
    %203 = vector.load %arg10[%c1_140, %c1984_141] : memref<2x2048xf32, #tpu.memory_space<vmem>>, vector<1x64xf32>
    tpu.vector_store %arg10[%c1_140, %c1984_141], %202 {strides = array<i32>} : memref<2x2048xf32, #tpu.memory_space<vmem>>, vector<1x64xf32>,
    %c0_142 = arith.constant 0 : index
    %c0_143 = arith.constant 0 : index
    %204 = vector.load %arg10[%c0_142, %c0_143] : memref<2x2048xf32, #tpu.memory_space<vmem>>, vector<2x2048xf32>
    %c0_144 = arith.constant 0 : index
    %c0_145 = arith.constant 0 : index
    %205 = vector.load %arg6[%c0_144, %c0_145] : memref<2048x32xbf16, #tpu.memory_space<vmem>>, vector<2048x32xbf16>
    %206 = arith.truncf %204 : vector<2x2048xf32> to vector<2x2048xbf16>
    %cst_146 = arith.constant dense<0.000000e+00> : vector<2x32xf32>
    %207 = tpu.matmul %206, %205, %cst_146 {dimension_numbers = #tpu.dot_dimension_numbers<[1], [0], [0], [1], [0, 0, 1, 1], [], []>} : vector<2x2048xbf16>, vector<2048x32xbf16>, vector<2x32xf32> -> vector<2x32xf32>
    %c0_147 = arith.constant 0 : index
    %c0_148 = arith.constant 0 : index
    %208 = vector.load %arg8[%c0_147, %c0_148] : memref<1x32xf32, #tpu.memory_space<vmem>>, vector<1x32xf32>
    %209 = vector.broadcast %208 : vector<1x32xf32> to vector<2x32xf32>
    %210 = arith.addf %207, %209 : vector<2x32xf32>
    %c0_149 = arith.constant 0 : index
    %c0_150 = arith.constant 0 : index
    %211 = vector.load %arg9[%c0_149, %c0_150] : memref<2x32xf32, #tpu.memory_space<vmem>>, vector<2x32xf32>
    tpu.vector_store %arg9[%c0_149, %c0_150], %210 {strides = array<i32>} : memref<2x32xf32, #tpu.memory_space<vmem>>, vector<2x32xf32>,
    return
  }
  func.func @transform_0(%arg0: i32) -> (i32, i32) {
    %c0_i32 = arith.constant 0 : i32
    %c0_i32_0 = arith.constant 0 : i32
    %c0_i32_1 = arith.constant 0 : i32
    return %c0_i32, %c0_i32_0 : i32, i32
  }
  func.func @transform_1(%arg0: i32) -> (i32, i32) {
    %c0_i32 = arith.constant 0 : i32
    %c0_i32_0 = arith.constant 0 : i32
    %c0_i32_1 = arith.constant 0 : i32
    return %c0_i32, %c0_i32_0 : i32, i32
  }
  func.func @transform_2(%arg0: i32) -> (i32, i32, i32) {
    %c0_i32 = arith.constant 0 : i32
    %c0_i32_0 = arith.constant 0 : i32
    %c0_i32_1 = arith.constant 0 : i32
    %c0_i32_2 = arith.constant 0 : i32
    return %c0_i32, %c0_i32_0, %c0_i32_1 : i32, i32, i32
  }
  func.func @transform_3(%arg0: i32) -> (i32, i32, i32) {
    %c0_i32 = arith.constant 0 : i32
    %c0_i32_0 = arith.constant 0 : i32
    %c0_i32_1 = arith.constant 0 : i32
    %c0_i32_2 = arith.constant 0 : i32
    return %c0_i32, %c0_i32_0, %c0_i32_1 : i32, i32, i32
  }
  func.func @transform_4(%arg0: i32) -> (i32, i32, i32) {
    %c0_i32 = arith.constant 0 : i32
    %c0_i32_0 = arith.constant 0 : i32
    %c0_i32_1 = arith.constant 0 : i32
    %c0_i32_2 = arith.constant 0 : i32
    return %c0_i32, %c0_i32_0, %c0_i32_1 : i32, i32, i32
  }
  func.func @transform_5(%arg0: i32) -> (i32, i32) {
    %c0_i32 = arith.constant 0 : i32
    %c0_i32_0 = arith.constant 0 : i32
    %c0_i32_1 = arith.constant 0 : i32
    return %c0_i32, %c0_i32_0 : i32, i32
  }
  func.func @transform_6(%arg0: i32) -> (i32, i32) {
    %c0_i32 = arith.constant 0 : i32
    %c0_i32_0 = arith.constant 0 : i32
    %c0_i32_1 = arith.constant 0 : i32
    return %c0_i32, %c0_i32_0 : i32, i32
  }
  func.func @transform_7(%arg0: i32) -> (i32, i32) {
    %c0_i32 = arith.constant 0 : i32
    %c0_i32_0 = arith.constant 0 : i32
    %c0_i32_1 = arith.constant 0 : i32
    return %c0_i32, %c0_i32_0 : i32, i32
  }
  func.func @transform_8(%arg0: i32) -> (i32, i32) {
    %c0_i32 = arith.constant 0 : i32
    %c0_i32_0 = arith.constant 0 : i32
    %c0_i32_1 = arith.constant 0 : i32
    return %c0_i32, %c0_i32_0 : i32, i32
  }
}

</mosaic_0001>

<bundles_post_ra>
// kernel: tile.8
= control target key start
LH: loop header
LB: loop body
LE: loop exit
PB: predicated region body
PF: predicated region fallthrough
CT: control target
= control target key end

     0   :  { %s22_s0 = inlined_call_operand.vmem [shape: f32[64], index: 0, kind: input, shape index: {}]   ;;  %s23_s1 = inlined_call_operand.vmem [shape: f32[2,64], index: 1, kind: output, shape index: {}]  }
   0x1   :  { %v4_v0 = vld [vmem:[%s22_s0] ss:$0 sm:$0xff] }
   0x2   :  { %5 = vst [vmem:[%s23_s1] sm:$0x3] %v4_v0 }

// kernel: tile.9
= control target key start
LH: loop header
LB: loop body
LE: loop exit
PB: predicated region body
PF: predicated region fallthrough
CT: control target
= control target key end

     0   :  { %vm7_vm0 = vcmask 523264   ;;  %vm13_vm1 = vcmask 1048064   ;;  %s39_s0 = inlined_call_operand.vmem [shape: f32[2,64], index: 0, kind: input, shape index: {}]   ;;  %s40_s1 = inlined_call_operand.vmem [shape: f32[1,128], index: 1, kind: output, shape index: {}]  }
   0x1   :  { %v4_v0 = vld [vmem:[%s39_s0] sm:$0x3]  ;;  %s22_s0 = smov 64  }
   0x2   :  { %5 = vst [vmem:[#allocation1] sm:$0x3] %v4_v0 }
   0x9   :  { %v10_v1 = vld [vmem:[#allocation1 + $0x1] sm:$0x1]   ;;  %v6_v2 = vld [vmem:[#allocation1] sm:$0x1]  }
   0xa   :  { %11 = vrot.lane.b32.xlu0 %v10_v1, %s22_s0  ;;  %8 = vst.msk [vmem:[#allocation0] sm:$0x1] %vm7_vm0, %v6_v2  }
  0x7c   :  { %v12_v3 = vpop.permute.xlu0 %11  }
  0x7d   :  { %14 = vst.msk [vmem:[#allocation0] sm:$0x1] %vm13_vm1, %v12_v3  }
  0x84   :  { %v18_v4 = vld [vmem:[#allocation0] sm:$0x1] }
  0x85   :  { %20 = vst [vmem:[%s40_s1] sm:$0x1] %v18_v4 }

// kernel: diffusion_forward.1
= control target key start
LH: loop header
LB: loop body
LE: loop exit
PB: predicated region body
PF: predicated region fallthrough
CT: control target
= control target key end

     0   :  { %v2853_v3 = vmov 0.0   ;;  %vm2854_vm0 = vmmov 0   ;;  %vm48_vm1 = vcmask 261120   ;;  %v2855_v7 = vmov 0   ;;  %s3692_s0 = inlined_call_operand.vmem [shape: f32[32,128], index: 0, kind: input, shape index: {}]   ;;  %s3693_s1 = inlined_call_operand.vmem [shape: f32[1,128], index: 1, kind: input, shape index: {}]   ;;  %s3694_s2 = inlined_call_operand.vmem [shape: bf16[2,8,32], index: 2, kind: input, shape index: {}]   ;;  %s3695_s3 = inlined_call_operand.vmem [shape: bf16[2,8,72], index: 3, kind: input, shape index: {}]   ;;  %s3696_s4 = inlined_call_operand.vmem [shape: bf16[2,32,8], index: 4, kind: input, shape index: {}]   ;;  %s3697_s5 = inlined_call_operand.vmem [shape: bf16[2048,32], index: 5, kind: input, shape index: {}]   ;;  %s3698_s6 = inlined_call_operand.vmem [shape: f32[32,8], index: 6, kind: input, shape index: {}]   ;;  %s3699_s7 = inlined_call_operand.vmem [shape: f32[1,32], index: 7, kind: input, shape index: {}]   ;;  %s3700_s8 = inlined_call_operand.hbm [shape: f32[2,32], index: 8, kind: output, shape index: {}]  }
   0x1   :  { %v2920_v0 = vld [vmem:[%s3692_s0] sm:$0xff]  ;;  %v2925_v1 = vld [vmem:[%s3692_s0 + $0x8] sm:$0xff]  ;;  %v2930_v2 = vld [vmem:[%s3692_s0 + $0x10] sm:$0xff]  ;;  %2610 = vmatprep.subr.bf16.mxu0 %v2853_v3  ;;  %2614 = vmatprep.mubr.msk.bf16.mxu0 %vm2854_vm0, %v2853_v3 }
   0x2   :  { %v41_v4 = vpack.c.bf16 %v2925_v1, %v2920_v0  ;;  %v2938_v5 = vld [vmem:[%s3692_s0 + $0x18] sm:$0xff]  ;;  %v2945_v6 = vld [vmem:[%s3698_s6] sm:$0xff]  ;;  %2687 = vset.pattern.permute.xlu0 %v2855_v7  ;;  %2618 = vmatprep.subr.bf16.mxu1 %v2853_v3 }
   0x3   :  { %v42_v8 = vpack.c.bf16 %v2938_v5, %v2930_v2  ;;  %45 = vperm.xlu0 %2687, %v2945_v6   ;;  %2628 = vmatprep.mubr.msk.bf16.mxu1 %vm2854_vm0, %v2853_v3  ;;  %v40_v9 = vld [vmem:[%s3694_s2] sm:$0xf] }
   0x4   :  { %2611 = vmatpush3.bf16.msra.mxu0 %v41_v4 }
   0x5   :  { %2612 = vmatprep.subr.bf16.mxu0 %v2853_v3 }
   0x8   :  { %2613 = vmatpush3.bf16.msra.mxu0 %v42_v8 }
   0xb   :  { %2615 = vmatmul.mubr.msk.bf16.vlgmr.msra.gmra.mrb[0].mxu0 %vm48_vm1, %v40_v9 }
   0xc   :  { %13 = vsyncpa [#allocation4], 0  ;;  %v2961_v14 = vld [vmem:[%s3693_s1] ss:$0 sm:$0xff]  ;;  %s2856_s18 = smov 8   ;;  %s2857_s19 = smov 9  }
   0xd   :  { %s2858_s20 = smov 7   ;;  %s2859_s21 = smov 1   ;;  %v2862_v19 = vmov 1   ;;  %vm130_vm2 = vcmask 1043456   ;;  %v93_v34 = vld [vmem:[%s3695_s3] sm:$0xf] }
   0xe   :  { %s2860_s22 = smov 127   ;;  %s2861_s1 = smov 121   ;;  %2688 = vset.pattern.permute.xlu1 %v2862_v19  ;;  %vm126_vm3 = vcmask 588800   ;;  %v2695_v35 = vld [vmem:[%s3696_s4] sm:$0xff]   ;;  %vm209_vm4 = vcmask 64512   ;;  %v2992_v36 = vld [vmem:[%s3698_s6 + $0x8] sm:$0xff] }
   0xf   :  { %s2863_s23 = smov 120   ;;  %s2864_s24 = smov 119   ;;  %2634 = vmatprep.mubr.msk.bf16.mxu0 %vm209_vm4, %v2695_v35  ;;  %v2865_v37 = vmov 2   ;;  %v2999_v38 = vld [vmem:[%s3698_s6 + $0x10] sm:$0xff]  ;;  %v3004_v39 = vld [vmem:[%s3698_s6 + $0x18] sm:$0xff]  ;;  %v2696_v49 = vld [vmem:[%s3696_s4 + $0x8] sm:$0xff]  }
  0x10   :  { %2689 = vset.pattern.permute.xlu0 %v2865_v37  ;;  %v2866_v50 = vmov 3   ;;  %vm493_vm5 = vcmask 516096   ;;  %vm508_vm6 = vcmask 1040896   ;;  %vm2246_vm7 = vcmask 254976  }
  0x82   :  { %v46_v10 = vpop.permute.xlu0 %45 }
  0xde   :  { %v86_v11 = vpop.f32.mrb[0].mxu0 }
  0xdf   :  { %v87_v12 = vadd.f32 %v86_v11, %v46_v10  ;;  %v2616_v13 = vpop.f32.mrb[1].mxu0 }
  0xe0   :  { %v89_v15 = vpop.f32.mrb[2].mxu0 }
  0xe1   :  { %v92_v16 = vmax.f32 %v87_v12, 0.0  ;;  %v2617_v17 = vpop.f32.mrb[3].mxu0 }
  0xe2   :  { %v2867_v17 = vmov 4  }
  0xe3   :  { %v100_v18 = vmul.f32 %v2961_v14, %v92_v16 }
  0xe5   :  { %103 = vrot.lane.b32.xlu1 %v100_v18, %s2856_s18  ;;  %101 = vrot.lane.b32.xlu0 %v100_v18, %s2857_s19 }
  0xe9   :  { %105 = vrot.lane.b32.xlu1 %v100_v18, %s2858_s20  ;;  %107 = vrot.lane.b32.xlu0 %v100_v18, %s2859_s21 }
  0xed   :  { %109 = vrot.lane.b32.xlu1 %v100_v18, %s2860_s22  ;;  %111 = vrot.lane.b32.xlu0 %v100_v18, %s2861_s1 }
  0xf1   :  { %113 = vrot.lane.b32.xlu1 %v100_v18, %s2863_s23  ;;  %115 = vrot.lane.b32.xlu0 %v100_v18, %s2864_s24 }
  0xf5   :  { %123 = vperm.xlu1 %2688, %v2945_v6   ;;  %181 = vperm.xlu0 %2689, %v2945_v6  }
  0xf9   :  { %2690 = vset.pattern.permute.xlu1 %v2865_v37  ;;  %196 = vperm.xlu0 %2689, %v3004_v39  }
  0xfa   :  { %186 = vperm.xlu1 %2690, %v2992_v36  }
  0xfd   :  { %2692 = vset.pattern.permute.xlu0 %v2867_v17 }
  0xfe   :  { %191 = vperm.xlu1 %2690, %v2999_v38  }
 0x102   :  { %2691 = vset.pattern.permute.xlu1 %v2866_v50 }
 0x103   :  { %277 = vperm.xlu1 %2691, %v2945_v6  }
 0x157   :  { %v104_v20 = vpop.permute.xlu1 %103  ;;  %v102_v21 = vpop.permute.xlu0 %101 }
 0x158   :  { %v117_v22 = vpack.c.bf16 %v104_v20, %v102_v21 }
 0x15a   :  { %2619 = vmatpush3.bf16.msra.mxu1 %v117_v22 }
 0x15b   :  { %v106_v23 = vpop.permute.xlu1 %105  ;;  %v108_v24 = vpop.permute.xlu0 %107  ;;  %2620 = vmatprep.subr.bf16.mxu1 %v2853_v3 }
 0x15c   :  { %v118_v25 = vpack.c.bf16 %v108_v24, %v106_v23 }
 0x15e   :  { %2621 = vmatpush3.bf16.msra.mxu1 %v118_v25 }
 0x15f   :  { %v110_v26 = vpop.permute.xlu1 %109  ;;  %v112_v27 = vpop.permute.xlu0 %111  ;;  %2622 = vmatprep.subr.bf16.mxu1 %v2853_v3 }
 0x160   :  { %v119_v28 = vpack.c.bf16 %v110_v26, %v100_v18 }
 0x162   :  { %2623 = vmatpush3.bf16.msra.mxu1 %v119_v28 }
 0x163   :  { %v114_v29 = vpop.permute.xlu1 %113  ;;  %v116_v30 = vpop.permute.xlu0 %115  ;;  %2624 = vmatprep.subr.bf16.mxu1 %v2853_v3 }
 0x164   :  { %v120_v31 = vpack.c.bf16 %v114_v29, %v112_v27  ;;  %v121_v32 = vpack.c.bf16 %v116_v30, %v116_v30 }
 0x166   :  { %2625 = vmatpush3.bf16.msra.mxu1 %v120_v31  ;;  %v132_v33 = vsel %vm130_vm2, %v121_v32, 0  ;;  %v2271_v31 = vld [vmem:[%s3695_s3 + $0x4] sm:$0xf]  ;;  %v2697_v32 = vld [vmem:[%s3696_s4 + $0x10] sm:$0xff]  }
 0x167   :  { %2626 = vmatprep.subr.bf16.mxu1 %v2853_v3 }
 0x16a   :  { %2627 = vmatpush3.bf16.msra.mxu1 %v132_v33  ;;  %v2868_v33 = vmov 5  }
 0x16b   :  { %2646 = vmatprep.subr.bf16.mxu1 %v2853_v3  ;;  %2693 = vset.pattern.permute.xlu1 %v2868_v33 }
 0x16d   :  { %2629 = vmatmul.mubr.msk.bf16.vlgmr.msra.gmra.mrb[0].mxu1 %vm126_vm3, %v93_v34 }
 0x16e   :  { %2656 = vmatprep.mubr.msk.bf16.mxu1 %vm2854_vm0, %v2853_v3 }
 0x174   :  { %v124_v40 = vpop.permute.xlu1 %123  ;;  %v182_v51 = vpop.permute.xlu0 %181 }
 0x178   :  { %v197_v55 = vpop.permute.xlu0 %196 }
 0x179   :  { %v187_v52 = vpop.permute.xlu1 %186 }
 0x17d   :  { %v192_v58 = vpop.permute.xlu1 %191 }
 0x240   :  { %v168_v41 = vpop.f32.mrb[0].mxu1 }
 0x241   :  { %v169_v42 = vadd.f32 %v168_v41, %v124_v40  ;;  %v2630_v43 = vpop.f32.mrb[1].mxu1 }
 0x242   :  { %v171_v44 = vpop.f32.mrb[2].mxu1 }
 0x243   :  { %v174_v45 = vmax.f32 %v169_v42, 0.0  ;;  %v2631_v46 = vpop.f32.mrb[3].mxu1 }
 0x245   :  { %v179_v47 = vpack.c.bf16 %v174_v45, %v174_v45  ;;  %v2869_v45 = vmov 1983009808  }
 0x246   :  { %v497_v46 = vunpack.c.l.s4 %v2869_v45  ;;  %v2724_v45 = vld [vmem:[%s3697_s5 + $0x30] sm:$0xff]  }
 0x247   :  { %2666 = vmatprep.subr.msk.bf16.mxu0 %vm130_vm2, %v179_v47  ;;  %v217_v48 = vsel %vm130_vm2, %v179_v47, 0  ;;  %v499_v47 = vlaneseq }
 0x248   :  { %2633 = vmatpush3.bf16.msra.mxu0 %v217_v48  ;;  %v2701_v48 = vld [vmem:[%s3697_s5 + $0xc0] sm:$0xff]  }
 0x249   :  { %2638 = vmatprep.subr.bf16.mxu0 %v2853_v3 }
 0x24b   :  { %2635 = vmatmul.mubr.msk.bf16.vlgmr.msra.gmra.mrb[4].mxu0 %vm209_vm4, %v2696_v49  ;;  %v2702_v49 = vld [vmem:[%s3697_s5 + $0x80] sm:$0xff]  }
 0x24c   :  { %2642 = vmatprep.mubr.msk.bf16.mxu0 %vm2854_vm0, %v2853_v3 }
 0x31e   :  { %v2636_v53 = vpop.f32.mrb[4].mxu0 }
 0x31f   :  { %v253_v54 = vpop.f32.mrb[5].mxu0  ;;  %v262_v62 = vadd.f32 %v2636_v53, %v192_v58  ;;  %v2706_v58 = vld [vmem:[%s3697_s5 + $0x88] sm:$0xff]  }
 0x320   :  { %v254_v56 = vadd.f32 %v253_v54, %v182_v51  ;;  %v2637_v57 = vpop.f32.mrb[6].mxu0  ;;  %v498_v51 = vunpack.c.0.s8 %v497_v46  ;;  %v2703_v54 = vld [vmem:[%s3697_s5 + $0x48] sm:$0xff]  }
 0x321   :  { %v256_v59 = vpop.f32.mrb[7].mxu0  ;;  %v265_v60 = vadd.f32 %v2637_v57, %v197_v55  ;;  %v3030_v9 = vadd.f32 %v262_v62, %v2930_v2  ;;  %v2704_v55 = vld [vmem:[%s3697_s5 + $0x8] sm:$0xff]   ;;  %v2707_v62 = vld [vmem:[%s3697_s5 + $0x50] sm:$0xff]  }
 0x322   :  { %v257_v61 = vadd.f32 %v256_v59, %v187_v52  ;;  %v3019_v63 = vadd.f32 %v254_v56, %v2920_v0  ;;  %v2269_v0 = vld [vmem:[%s3694_s2 + $0x4] sm:$0xf]  ;;  %v500_v52 = vshrl.u32 %v499_v47, 7  ;;  %v2705_v57 = vld [vmem:[%s3697_s5 + $0xc8] sm:$0xff]  }
 0x323   :  { %v3025_v7 = vadd.f32 %v265_v60, %v2938_v5 }
 0x324   :  { %v3022_v4 = vadd.f32 %v257_v61, %v2925_v1  ;;  %v278_v1 = vpop.permute.xlu1 %277  ;;  %v3095_v60 = vsub.s32 %v498_v51, %v500_v52  ;;  %v2728_v52 = vld [vmem:[%s3697_s5 + $0x38] sm:$0xff]  }
 0x325   :  { %v275_v10 = vpack.c.bf16 %v3025_v7, %v3030_v9 }
 0x326   :  { %v274_v8 = vpack.c.bf16 %v3022_v4, %v3019_v63 }
 0x328   :  { %2639 = vmatpush3.bf16.msra.mxu0 %v274_v8  ;;  %v2708_v8 = vld [vmem:[%s3697_s5 + $0x10] sm:$0xff]  }
 0x329   :  { %2640 = vmatprep.subr.bf16.mxu0 %v2853_v3 }
 0x32c   :  { %2641 = vmatpush3.bf16.msra.mxu0 %v275_v10 }
 0x32f   :  { %2643 = vmatmul.mubr.msk.bf16.vlgmr.msra.gmra.mrb[8].mxu0 %vm48_vm1, %v2269_v0 }
 0x330   :  { %2662 = vmatprep.mubr.msk.bf16.mxu0 %vm209_vm4, %v2697_v32 }
 0x402   :  { %v317_v5 = vpop.f32.mrb[8].mxu0 }
 0x403   :  { %v318_v11 = vadd.f32 %v317_v5, %v278_v1  ;;  %v2644_v12 = vpop.f32.mrb[9].mxu0 }
 0x404   :  { %v320_v13 = vpop.f32.mrb[10].mxu0 }
 0x405   :  { %v323_v2 = vmax.f32 %v318_v11, 0.0  ;;  %v2645_v15 = vpop.f32.mrb[11].mxu0 }
 0x406   :  { %v2710_v15 = vld [vmem:[%s3697_s5 + $0x90] sm:$0xff]  }
 0x407   :  { %v326_v16 = vmul.f32 %v2961_v14, %v323_v2  ;;  %v2709_v2 = vld [vmem:[%s3697_s5 + $0xd0] sm:$0xff]  }
 0x409   :  { %329 = vrot.lane.b32.xlu1 %v326_v16, %s2856_s18  ;;  %327 = vrot.lane.b32.xlu0 %v326_v16, %s2857_s19 }
 0x40d   :  { %333 = vrot.lane.b32.xlu1 %v326_v16, %s2859_s21  ;;  %331 = vrot.lane.b32.xlu0 %v326_v16, %s2858_s20 }
 0x411   :  { %337 = vrot.lane.b32.xlu1 %v326_v16, %s2861_s1  ;;  %335 = vrot.lane.b32.xlu0 %v326_v16, %s2860_s22 }
 0x415   :  { %341 = vrot.lane.b32.xlu1 %v326_v16, %s2864_s24  ;;  %339 = vrot.lane.b32.xlu0 %v326_v16, %s2863_s23 }
 0x419   :  { %349 = vperm.xlu0 %2692, %v2945_v6   ;;  %406 = vperm.xlu1 %2693, %v2945_v6   ;;  %v2698_v6 = vld [vmem:[%s3696_s4 + $0x18] sm:$0xff]   ;;  %s2870_s4 = smov 64  }
 0x41d   :  { %2694 = vset.pattern.permute.xlu0 %v2868_v33  ;;  %410 = vperm.xlu1 %2693, %v2992_v36   ;;  %v2699_v36 = vld [vmem:[%s3697_s5 + $0x40] sm:$0xff]  }
 0x41e   :  { %414 = vperm.xlu0 %2694, %v2999_v38   ;;  %v2700_v38 = vld [vmem:[%s3697_s5] sm:$0xff]  }
 0x47b   :  { %v330_v14 = vpop.permute.xlu1 %329  ;;  %v328_v18 = vpop.permute.xlu0 %327 }
 0x47c   :  { %v343_v19 = vpack.c.bf16 %v330_v14, %v328_v18 }
 0x47e   :  { %2647 = vmatpush3.bf16.msra.mxu1 %v343_v19 }
 0x47f   :  { %v334_v20 = vpop.permute.xlu1 %333  ;;  %v332_v21 = vpop.permute.xlu0 %331  ;;  %2648 = vmatprep.subr.bf16.mxu1 %v2853_v3 }
 0x480   :  { %v344_v22 = vpack.c.bf16 %v334_v20, %v332_v21 }
 0x482   :  { %2649 = vmatpush3.bf16.msra.mxu1 %v344_v22  ;;  %v2713_v22 = vld [vmem:[%s3697_s5 + $0xd8] sm:$0xff]  }
 0x483   :  { %v338_v23 = vpop.permute.xlu1 %337  ;;  %v336_v24 = vpop.permute.xlu0 %335  ;;  %2650 = vmatprep.subr.bf16.mxu1 %v2853_v3 }
 0x484   :  { %v345_v25 = vpack.c.bf16 %v336_v24, %v326_v16 }
 0x486   :  { %2651 = vmatpush3.bf16.msra.mxu1 %v345_v25 }
 0x487   :  { %v342_v26 = vpop.permute.xlu1 %341  ;;  %v340_v27 = vpop.permute.xlu0 %339  ;;  %2652 = vmatprep.subr.bf16.mxu1 %v2853_v3 }
 0x488   :  { %v346_v28 = vpack.c.bf16 %v340_v27, %v338_v23  ;;  %v347_v29 = vpack.c.bf16 %v342_v26, %v342_v26  ;;  %v2715_v23 = vld [vmem:[%s3697_s5 + $0x60] sm:$0xff]  }
 0x48a   :  { %2653 = vmatpush3.bf16.msra.mxu1 %v346_v28  ;;  %v356_v30 = vsel %vm130_vm2, %v347_v29, 0 }
 0x48b   :  { %2654 = vmatprep.subr.bf16.mxu1 %v2853_v3 }
 0x48e   :  { %2655 = vmatpush3.bf16.msra.mxu1 %v356_v30  ;;  %v2716_v30 = vld [vmem:[%s3697_s5 + $0x20] sm:$0xff]  }
 0x48f   :  { %2456 = vmatprep.subr.bf16.mxu1 %v2701_v48  ;;  %v2725_v48 = vld [vmem:[%s3697_s5 + $0xf0] sm:$0xff]  }
 0x491   :  { %2657 = vmatmul.mubr.msk.bf16.vlgmr.msra.gmra.mrb[4].mxu1 %vm126_vm3, %v2271_v31 }
 0x492   :  { %2457 = vmatpush3.bf16.msra.mxu1 %v2702_v49  ;;  %v2726_v49 = vld [vmem:[%s3697_s5 + $0xb0] sm:$0xff]  }
 0x493   :  { %2458 = vmatprep.subr.bf16.mxu1 %v2705_v57 }
 0x496   :  { %2459 = vmatpush3.bf16.msra.mxu1 %v2706_v58 }
 0x497   :  { %2460 = vmatprep.subr.bf16.mxu1 %v2709_v2 }
 0x498   :  { %v350_v3 = vpop.permute.xlu0 %349  ;;  %v407_v50 = vpop.permute.xlu1 %406 }
 0x49a   :  { %2461 = vmatpush3.bf16.msra.mxu1 %v2710_v15 }
 0x49b   :  { %2462 = vmatprep.subr.bf16.mxu1 %v2713_v22 }
 0x49c   :  { %v411_v5 = vpop.permute.xlu1 %410 }
 0x49d   :  { %v415_v53 = vpop.permute.xlu0 %414 }
 0x564   :  { %v392_v34 = vpop.f32.mrb[4].mxu1 }
 0x565   :  { %v393_v35 = vadd.f32 %v392_v34, %v350_v3  ;;  %v2658_v37 = vpop.f32.mrb[5].mxu1  ;;  %v2717_v3 = vld [vmem:[%s3697_s5 + $0xe0] sm:$0xff]  }
 0x566   :  { %v395_v40 = vpop.f32.mrb[6].mxu1  ;;  %v2718_v34 = vld [vmem:[%s3697_s5 + $0xa0] sm:$0xff]  }
 0x567   :  { %v398_v41 = vmax.f32 %v393_v35, 0.0  ;;  %v2659_v42 = vpop.f32.mrb[7].mxu1  ;;  %v2719_v35 = vld [vmem:[%s3697_s5 + $0x68] sm:$0xff]  }
 0x568   :  { %v2720_v42 = vld [vmem:[%s3697_s5 + $0x28] sm:$0xff]  }
 0x569   :  { %v404_v43 = vpack.c.bf16 %v398_v41, %v398_v41 }
 0x56b   :  { %2667 = vmatprep.subr.msk.bf16.mxu0 %vm130_vm2, %v404_v43  ;;  %v438_v44 = vsel %vm130_vm2, %v404_v43, 0 }
 0x56c   :  { %2661 = vmatpush3.bf16.msra.mxu0 %v438_v44 }
 0x56d   :  { %2434 = vmatprep.subr.bf16.mxu0 %v2699_v36  ;;  %v2722_v36 = vld [vmem:[%s3697_s5 + $0xa8] sm:$0xff]  }
 0x56f   :  { %2663 = vmatmul.mubr.msk.bf16.vlgmr.msra.gmra.mrb[12].mxu0 %vm209_vm4, %v2698_v6  ;;  %v2721_v6 = vld [vmem:[%s3697_s5 + $0xe8] sm:$0xff]  }
 0x570   :  { %2435 = vmatpush3.bf16.msra.mxu0 %v2700_v38  ;;  %v2723_v38 = vld [vmem:[%s3697_s5 + $0x70] sm:$0xff]  }
 0x571   :  { %2436 = vmatprep.subr.bf16.mxu0 %v2703_v54  ;;  %v2731_v54 = vld [vmem:[%s3697_s5 + $0x140] sm:$0xff]  }
 0x574   :  { %2437 = vmatpush3.bf16.msra.mxu0 %v2704_v55  ;;  %v2733_v55 = vld [vmem:[%s3697_s5 + $0x1c0] sm:$0xff]  }
 0x575   :  { %2438 = vmatprep.subr.bf16.mxu0 %v2707_v62 }
 0x578   :  { %2439 = vmatpush3.bf16.msra.mxu0 %v2708_v8 }
 0x642   :  { %v2664_v56 = vpop.f32.mrb[12].mxu0 }
 0x643   :  { %v483_v59 = vadd.f32 %v2664_v56, %v415_v53  ;;  %v474_v61 = vpop.f32.mrb[13].mxu0  ;;  %v2729_v53 = vld [vmem:[%s3697_s5 + $0xf8] sm:$0xff]  }
 0x644   :  { %v475_v10 = vadd.f32 %v474_v61, %v407_v50  ;;  %v3103_v0 = vpop.f32.mrb[14].mxu0  ;;  %v2727_v50 = vld [vmem:[%s3697_s5 + $0x78] sm:$0xff]  }
 0x645   :  { %v491_v1 = vadd.f32 %v483_v59, %v3030_v9  ;;  %v477_v11 = vpop.f32.mrb[15].mxu0  ;;  %v2712_v9 = vld [vmem:[%s3697_s5 + $0x18] sm:$0xff]  }
 0x646   :  { %v489_v12 = vadd.f32 %v475_v10, %v3019_v63  ;;  %v478_v13 = vadd.f32 %v477_v11, %v411_v5  ;;  %v2711_v63 = vld [vmem:[%s3697_s5 + $0x58] sm:$0xff]  }
 0x647   :  { %v3114_v16 = vrot.slane %v491_v1, %v3095_v60  ;;  %v617_v17 = vcombine.high %v491_v1, %v491_v1  ;;  %593 = vst.msk [vmem:[#allocation2 + $0x10] sm:$0x1] %vm493_vm5, %v491_v1  ;;  %2440 = vmatprep.subr.bf16.mxu0 %v2711_v63 }
 0x648   :  { %v519_v14 = vcombine.high %v489_v12, %v489_v12  ;;  %v490_v18 = vadd.f32 %v478_v13, %v3022_v4  ;;  %v502_v19 = vrot.slane %v489_v12, %v3095_v60  ;;  %494 = vst.msk [vmem:[#allocation2] sm:$0x1] %vm493_vm5, %v489_v12  ;;  %v2714_v4 = vld [vmem:[%s3697_s5 + $0x98] sm:$0xff]   ;;  %2441 = vmatpush3.bf16.msra.mxu0 %v2712_v9 }
 0x649   :  { %v3127_v20 = vrot.slane %v617_v17, %v3095_v60  ;;  %v3131_v21 = vcombine.high %v3114_v16, %v3114_v16  ;;  %2442 = vmatprep.subr.bf16.mxu0 %v2715_v23  ;;  %2463 = vmatpush3.bf16.msra.mxu1 %v2714_v4  ;;  %v602_v5 = vrot.slane %v3114_v16, 7 }
 0x64a   :  { %v3143_v24 = vrot.slane %v490_v18, %v3095_v60  ;;  %v568_v25 = vcombine.high %v490_v18, %v490_v18  ;;  %691 = vrot.lane.b32.xlu1 %v502_v19, %s2870_s4  ;;  %v526_v26 = vrot.slane %v519_v14, %v3095_v60  ;;  %v510_v27 = vcombine.high %v502_v19, %v502_v19 }
 0x64b   :  { %544 = vst.msk [vmem:[#allocation2 + $0x8] sm:$0x1] %vm493_vm5, %v490_v18  ;;  %v503_v28 = vrot.slane %v502_v19, 7  ;;  %v3150_v29 = vcombine.high %v3127_v20, %v3127_v20  ;;  %610 = vst.msk [vmem:[#allocation2 + $0x12] sm:$0x1] %vm493_vm5, %v3131_v21  ;;  %2464 = vmatprep.subr.bf16.mxu1 %v2717_v3  ;;  %v611_v1 = vrot.slane %v3131_v21, 7 }
 0x64c   :  { %626 = vst.msk [vmem:[#allocation2 + $0x14] sm:$0x1] %vm493_vm5, %v3127_v20  ;;  %v3160_v31 = vrot.slane %v568_v25, %v3095_v60  ;;  %703 = vrot.lane.b32.xlu0 %v526_v26, %s2870_s4  ;;  %v535_v32 = vcombine.high %v526_v26, %v526_v26  ;;  %512 = vst.msk [vmem:[#allocation2 + $0x2] sm:$0x1] %vm493_vm5, %v510_v27  ;;  %v559_v33 = vcombine.high %v3143_v24, %v3143_v24 }
 0x64d   :  { %528 = vst.msk [vmem:[#allocation2 + $0x4] sm:$0x1] %vm493_vm5, %v526_v26  ;;  %635 = vst.msk [vmem:[#allocation2 + $0x16] sm:$0x1] %vm493_vm5, %v3150_v29  ;;  %v3179_v37 = vrot.slane %v503_v28, 2  ;;  %v529_v40 = vrot.slane %v526_v26, 7  ;;  %2443 = vmatpush3.bf16.msra.mxu0 %v2716_v30  ;;  %2465 = vmatpush3.bf16.msra.mxu1 %v2718_v34 }
 0x64e   :  { %697 = vrot.lane.b32.xlu1 %v510_v27, %s2870_s4  ;;  %v584_v41 = vcombine.high %v3160_v31, %v3160_v31  ;;  %537 = vst.msk [vmem:[#allocation2 + $0x6] sm:$0x1] %vm493_vm5, %v535_v32  ;;  %577 = vst.msk [vmem:[#allocation2 + $0xc] sm:$0x1] %vm493_vm5, %v3160_v31  ;;  %v513_v43 = vrot.slane %v510_v27, 7  ;;  %2444 = vmatprep.subr.bf16.mxu0 %v2719_v35  ;;  %v538_v47 = vrot.slane %v535_v32, 7 }
 0x64f   :  { %561 = vst.msk [vmem:[#allocation2 + $0xa] sm:$0x1] %vm493_vm5, %v559_v33  ;;  %v3194_v44 = vrot.slane %v529_v40, 2  ;;  %2466 = vmatprep.subr.bf16.mxu1 %v2721_v6  ;;  %v562_v56 = vrot.slane %v559_v33, 7  ;;  %v553_v57 = vrot.slane %v3143_v24, 7  ;;  %v578_v62 = vrot.slane %v3160_v31, 7 }
 0x650   :  { %505 = vrot.lane.b32.xlu0 %v3179_v37, %s2870_s4  ;;  %586 = vst.msk [vmem:[#allocation2 + $0xe] sm:$0x1] %vm493_vm5, %v584_v41  ;;  %v3210_v46 = vrot.slane %v513_v43, 2  ;;  %v539_v51 = vrot.slane %v538_v47, 2  ;;  %v587_v59 = vrot.slane %v584_v41, 7  ;;  %v3268_v11 = vrot.slane %v611_v1, 2 }
 0x651   :  { %2445 = vmatpush3.bf16.msra.mxu0 %v2720_v42  ;;  %2467 = vmatpush3.bf16.msra.mxu1 %v2722_v36  ;;  %v3247_v58 = vrot.slane %v562_v56, 2  ;;  %v554_v61 = vrot.slane %v553_v57, 2  ;;  %v579_v10 = vrot.slane %v578_v62, 2  ;;  %v636_v12 = vrot.slane %v3150_v29, 7  ;;  %v2734_v40 = vld [vmem:[%s3697_s5 + $0x180] sm:$0xff]   ;;  %v2736_v6 = vld [vmem:[%s3697_s5 + $0x108] sm:$0xff]  }
 0x652   :  { %709 = vrot.lane.b32.xlu1 %v535_v32, %s2870_s4  ;;  %2446 = vmatprep.subr.bf16.mxu0 %v2723_v38  ;;  %v3253_v8 = vrot.slane %v587_v59, 2  ;;  %v3273_v13 = vrot.slane %v602_v5, 2  ;;  %v627_v2 = vrot.slane %v3127_v20, 7  ;;  %v2732_v32 = vld [vmem:[%s3697_s5 + $0x100] sm:$0xff]   ;;  %v2738_v47 = vld [vmem:[%s3697_s5 + $0x188] sm:$0xff]   ;;  %v2746_v5 = vld [vmem:[%s3697_s5 + $0x198] sm:$0xff]  }
 0x653   :  { %2468 = vmatprep.subr.bf16.mxu1 %v2725_v48  ;;  %v3278_v15 = vrot.slane %v636_v12, 2 }
 0x654   :  { %531 = vrot.lane.b32.xlu0 %v3194_v44, %s2870_s4 }
 0x655   :  { %2447 = vmatpush3.bf16.msra.mxu0 %v2724_v45  ;;  %2469 = vmatpush3.bf16.msra.mxu1 %v2726_v49  ;;  %v2739_v45 = vld [vmem:[%s3697_s5 + $0x150] sm:$0xff]  }
 0x656   :  { %515 = vrot.lane.b32.xlu1 %v3210_v46, %s2870_s4  ;;  %2448 = vmatprep.subr.bf16.mxu0 %v2727_v50  ;;  %v2741_v50 = vld [vmem:[%s3697_s5 + $0x1d0] sm:$0xff]  }
 0x657   :  { %2470 = vmatprep.subr.bf16.mxu1 %v2729_v53  ;;  %v2743_v53 = vld [vmem:[%s3697_s5 + $0x158] sm:$0xff]  }
 0x658   :  { %418 = vperm.xlu0 %2694, %v3004_v39   ;;  %v2730_v39 = vld [vmem:[%s3697_s5 + $0xb8] sm:$0xff]  }
 0x659   :  { %2449 = vmatpush3.bf16.msra.mxu0 %v2728_v52  ;;  %2471 = vmatpush3.bf16.msra.mxu1 %v2730_v39  ;;  %v2740_v52 = vld [vmem:[%s3697_s5 + $0x110] sm:$0xff]  }
 0x65a   :  { %540 = vrot.lane.b32.xlu1 %v539_v51, %s2870_s4  ;;  %2478 = vmatprep.subr.bf16.mxu0 %v2731_v54 }
 0x65b   :  { %2500 = vmatprep.subr.bf16.mxu1 %v2733_v55  ;;  %v2742_v55 = vld [vmem:[%s3697_s5 + $0x190] sm:$0xff]  }
 0x65c   :  { %721 = vrot.lane.b32.xlu0 %v559_v33, %s2870_s4 }
 0x65e   :  { %715 = vrot.lane.b32.xlu1 %v3143_v24, %s2870_s4 }
 0x660   :  { %733 = vrot.lane.b32.xlu0 %v584_v41, %s2870_s4 }
 0x662   :  { %727 = vrot.lane.b32.xlu1 %v3160_v31, %s2870_s4 }
 0x664   :  { %564 = vrot.lane.b32.xlu0 %v3247_v58, %s2870_s4 }
 0x666   :  { %555 = vrot.lane.b32.xlu1 %v554_v61, %s2870_s4 }
 0x668   :  { %589 = vrot.lane.b32.xlu0 %v3253_v8, %s2870_s4 }
 0x66a   :  { %580 = vrot.lane.b32.xlu1 %v579_v10, %s2870_s4 }
 0x66c   :  { %745 = vrot.lane.b32.xlu0 %v3131_v21, %s2870_s4 }
 0x66e   :  { %739 = vrot.lane.b32.xlu1 %v3114_v16, %s2870_s4  ;;  %v3282_v16 = vrot.slane %v627_v2, 2  ;;  %v2749_v2 = vld [vmem:[%s3697_s5 + $0x1e0] sm:$0xff]  }
 0x670   :  { %757 = vrot.lane.b32.xlu0 %v3150_v29, %s2870_s4 }
 0x672   :  { %751 = vrot.lane.b32.xlu1 %v3127_v20, %s2870_s4 }
 0x674   :  { %613 = vrot.lane.b32.xlu0 %v3268_v11, %s2870_s4 }
 0x676   :  { %604 = vrot.lane.b32.xlu1 %v3273_v13, %s2870_s4 }
 0x678   :  { %638 = vrot.lane.b32.xlu0 %v3278_v15, %s2870_s4 }
 0x67a   :  { %629 = vrot.lane.b32.xlu1 %v3282_v16, %s2870_s4 }
 0x6bc   :  { %v692_v17 = vpop.permute.xlu1 %691 }
 0x6bd   :  { %694 = vst.msk [vmem:[#allocation2 + $0x1] sm:$0x1] %vm493_vm5, %v692_v17 }
 0x6be   :  { %696 = vst.msk [vmem:[#allocation2 + $0x1] sm:$0x1] %vm508_vm6, %v3179_v37  ;;  %v704_v63 = vpop.permute.xlu0 %703 }
 0x6bf   :  { %706 = vst.msk [vmem:[#allocation2 + $0x5] sm:$0x1] %vm493_vm5, %v704_v63  ;;  %v2751_v63 = vld [vmem:[%s3697_s5 + $0x168] sm:$0xff]  }
 0x6c0   :  { %708 = vst.msk [vmem:[#allocation2 + $0x5] sm:$0x1] %vm508_vm6, %v3194_v44  ;;  %v698_v9 = vpop.permute.xlu1 %697  ;;  %v2737_v44 = vld [vmem:[%s3697_s5 + $0x1c8] sm:$0xff]  }
 0x6c1   :  { %700 = vst.msk [vmem:[#allocation2 + $0x3] sm:$0x1] %vm493_vm5, %v698_v9 }
 0x6c2   :  { %702 = vst.msk [vmem:[#allocation2 + $0x3] sm:$0x1] %vm508_vm6, %v3210_v46  ;;  %v506_v14 = vpop.permute.xlu0 %505 }
 0x6c3   :  { %509 = vst.msk [vmem:[#allocation2] sm:$0x1] %vm508_vm6, %v506_v14  ;;  %v2750_v14 = vld [vmem:[%s3697_s5 + $0x1a0] sm:$0xff]  }
 0x6c4   :  { %v710_v18 = vpop.permute.xlu1 %709 }
 0x6c5   :  { %712 = vst.msk [vmem:[#allocation2 + $0x7] sm:$0x1] %vm493_vm5, %v710_v18 }
 0x6c6   :  { %714 = vst.msk [vmem:[#allocation2 + $0x7] sm:$0x1] %vm508_vm6, %v539_v51  ;;  %v532_v19 = vpop.permute.xlu0 %531 }
 0x6c7   :  { %534 = vst.msk [vmem:[#allocation2 + $0x4] sm:$0x1] %vm508_vm6, %v532_v19  ;;  %v2753_v19 = vld [vmem:[%s3697_s5 + $0x1e8] sm:$0xff]  }
 0x6c8   :  { %v516_v20 = vpop.permute.xlu1 %515 }
 0x6c9   :  { %518 = vst.msk [vmem:[#allocation2 + $0x2] sm:$0x1] %vm508_vm6, %v516_v20  ;;  %v2752_v20 = vld [vmem:[%s3697_s5 + $0x128] sm:$0xff]  }
 0x6cc   :  { %v541_v21 = vpop.permute.xlu1 %540 }
 0x6cd   :  { %543 = vst.msk [vmem:[#allocation2 + $0x6] sm:$0x1] %vm508_vm6, %v541_v21  ;;  %v2755_v21 = vld [vmem:[%s3697_s5 + $0x170] sm:$0xff]  }
 0x6d0   :  { %v716_v22 = vpop.permute.xlu1 %715 }
 0x6d1   :  { %718 = vst.msk [vmem:[#allocation2 + $0x9] sm:$0x1] %vm493_vm5, %v716_v22 }
 0x6d2   :  { %720 = vst.msk [vmem:[#allocation2 + $0x9] sm:$0x1] %vm508_vm6, %v554_v61  ;;  %v2744_v61 = vld [vmem:[%s3697_s5 + $0x118] sm:$0xff]  }
 0x6d4   :  { %v728_v4 = vpop.permute.xlu1 %727  ;;  %v787_v23 = vld [vmem:[#allocation2] sm:$0xff] }
 0x6d5   :  { %730 = vst.msk [vmem:[#allocation2 + $0xd] sm:$0x1] %vm493_vm5, %v728_v4  ;;  %v1058_v24 = vrot.slane %v787_v23, %v3095_v60  ;;  %v1051_v25 = vcombine.high %v787_v23, %v787_v23  ;;  %v2754_v4 = vld [vmem:[%s3697_s5 + $0x1a8] sm:$0xff]  }
 0x6d6   :  { %732 = vst.msk [vmem:[#allocation2 + $0xd] sm:$0x1] %vm508_vm6, %v579_v10 }
 0x6d7   :  { %v419_v26 = vpop.permute.xlu0 %418  ;;  %v1066_v27 = vcombine.high %v1058_v24, %v1058_v24  ;;  %v1065_v28 = vrot.slane %v1051_v25, %v3095_v60  ;;  %v1135_v34 = vpack.c.bf16 %v1058_v24, %v1058_v24 }
 0x6d8   :  { %v486_v29 = vadd.f32 %v3103_v0, %v419_v26  ;;  %v556_v30 = vpop.permute.xlu1 %555  ;;  %v2735_v0 = vld [vmem:[%s3697_s5 + $0x148] sm:$0xff]   ;;  %v2756_v26 = vld [vmem:[%s3697_s5 + $0x130] sm:$0xff]  }
 0x6d9   :  { %558 = vst.msk [vmem:[#allocation2 + $0x8] sm:$0x1] %vm508_vm6, %v556_v30  ;;  %v1136_v31 = vpack.c.bf16 %v1066_v27, %v1066_v27  ;;  %v1067_v33 = vcombine.high %v1065_v28, %v1065_v28  ;;  %v1137_v43 = vpack.c.bf16 %v1065_v28, %v1065_v28  ;;  %v2759_v28 = vld [vmem:[%s3697_s5 + $0x178] sm:$0xff]  }
 0x6da   :  { %v492_v3 = vadd.f32 %v486_v29, %v3025_v7 }
 0x6db   :  { %v722_v35 = vpop.permute.xlu0 %721  ;;  %1958 = vmatprep.mubr.bf16.mxu0 %v1136_v31  ;;  %v1138_v37 = vpack.c.bf16 %v1067_v33, %v1067_v33  ;;  %v2758_v31 = vld [vmem:[%s3697_s5 + $0x1b0] sm:$0xff]   ;;  %v2761_v33 = vld [vmem:[%s3697_s5 + $0x1f8] sm:$0xff]  }
 0x6dc   :  { %v666_v41 = vcombine.high %v492_v3, %v492_v3  ;;  %642 = vst.msk [vmem:[#allocation2 + $0x18] sm:$0x1] %vm493_vm5, %v492_v3  ;;  %724 = vst.msk [vmem:[#allocation2 + $0xb] sm:$0x1] %vm493_vm5, %v722_v35  ;;  %v581_v42 = vpop.permute.xlu1 %580  ;;  %1959 = vmatmul.mubr.bf16.vlgmr.msra.gmra.mrb[16].mxu0 %v1135_v34  ;;  %v650_v7 = vrot.slane %v492_v3, %v3095_v60  ;;  %v2760_v3 = vld [vmem:[%s3697_s5 + $0x138] sm:$0xff]   ;;  %v2763_v35 = vld [vmem:[%s3697_s5 + $0x240] sm:$0xff]  }
 0x6dd   :  { %726 = vst.msk [vmem:[#allocation2 + $0xb] sm:$0x1] %vm508_vm6, %v3247_v58  ;;  %583 = vst.msk [vmem:[#allocation2 + $0xc] sm:$0x1] %vm508_vm6, %v581_v42  ;;  %2479 = vmatpush3.bf16.msra.mxu0 %v2732_v32  ;;  %1998 = vmatprep.mubr.bf16.mxu1 %v1138_v37  ;;  %v2745_v58 = vld [vmem:[%s3697_s5 + $0x1d8] sm:$0xff]  }
 0x6de   :  { %763 = vrot.lane.b32.xlu1 %v650_v7, %s2870_s4  ;;  %1999 = vmatmul.mubr.bf16.vlgmr.msra.gmra.mrb[8].mxu1 %v1137_v43  ;;  %v657_v36 = vcombine.high %v650_v7, %v650_v7  ;;  %v673_v38 = vrot.slane %v666_v41, %v3095_v60  ;;  %v651_v51 = vrot.slane %v650_v7, 7  ;;  %v2764_v41 = vld [vmem:[%s3697_s5 + $0x200] sm:$0xff]   ;;  %v2767_v7 = vld [vmem:[%s3697_s5 + $0x248] sm:$0xff]  }
 0x6df   :  { %2501 = vmatpush3.bf16.msra.mxu1 %v2734_v40  ;;  %v734_v46 = vpop.permute.xlu0 %733  ;;  %2480 = vmatprep.subr.bf16.mxu0 %v2735_v0  ;;  %v2762_v40 = vld [vmem:[%s3697_s5 + $0x1b8] sm:$0xff]   ;;  %v2765_v0 = vld [vmem:[%s3697_s5 + $0x2c0] sm:$0xff]  }
 0x6e0   :  { %736 = vst.msk [vmem:[#allocation2 + $0xf] sm:$0x1] %vm493_vm5, %v734_v46  ;;  %v740_v48 = vpop.permute.xlu1 %739  ;;  %769 = vrot.lane.b32.xlu0 %v657_v36, %s2870_s4  ;;  %659 = vst.msk [vmem:[#allocation2 + $0x1a] sm:$0x1] %vm493_vm5, %v657_v36  ;;  %2502 = vmatprep.subr.bf16.mxu1 %v2737_v44  ;;  %v682_v49 = vcombine.high %v673_v38, %v673_v38  ;;  %v660_v39 = vrot.slane %v657_v36, 7  ;;  %v3364_v57 = vrot.slane %v651_v51, 2 }
 0x6e1   :  { %675 = vst.msk [vmem:[#allocation2 + $0x1c] sm:$0x1] %vm493_vm5, %v673_v38  ;;  %742 = vst.msk [vmem:[#allocation2 + $0x11] sm:$0x1] %vm493_vm5, %v740_v48  ;;  %2481 = vmatpush3.bf16.msra.mxu0 %v2736_v6  ;;  %v676_v59 = vrot.slane %v673_v38, 7  ;;  %v2766_v43 = vld [vmem:[%s3697_s5 + $0x280] sm:$0xff]  }
 0x6e2   :  { %738 = vst.msk [vmem:[#allocation2 + $0xf] sm:$0x1] %vm508_vm6, %v3253_v8  ;;  %744 = vst.msk [vmem:[#allocation2 + $0x11] sm:$0x1] %vm508_vm6, %v3273_v13  ;;  %775 = vrot.lane.b32.xlu1 %v673_v38, %s2870_s4  ;;  %2482 = vmatprep.subr.bf16.mxu0 %v2739_v45  ;;  %v3377_v62 = vrot.slane %v660_v39, 2  ;;  %v2747_v8 = vld [vmem:[%s3697_s5 + $0x160] sm:$0xff]  }
 0x6e3   :  { %684 = vst.msk [vmem:[#allocation2 + $0x1e] sm:$0x1] %vm493_vm5, %v682_v49  ;;  %2503 = vmatpush3.bf16.msra.mxu1 %v2738_v47  ;;  %v565_v54 = vpop.permute.xlu0 %564  ;;  %v685_v10 = vrot.slane %v682_v49, 7  ;;  %v3388_v13 = vrot.slane %v676_v59, 2  ;;  %v2769_v6 = vld [vmem:[%s3697_s5 + $0x2c8] sm:$0xff]   ;;  %v2771_v38 = vld [vmem:[%s3697_s5 + $0x250] sm:$0xff]  }
 0x6e4   :  { %567 = vst.msk [vmem:[#allocation2 + $0xa] sm:$0x1] %vm508_vm6, %v565_v54  ;;  %v752_v56 = vpop.permute.xlu1 %751  ;;  %781 = vrot.lane.b32.xlu0 %v682_v49, %s2870_s4  ;;  %2504 = vmatprep.subr.bf16.mxu1 %v2741_v50  ;;  %v2768_v36 = vld [vmem:[%s3697_s5 + $0x208] sm:$0xff]   ;;  %v2773_v47 = vld [vmem:[%s3697_s5 + $0x2d0] sm:$0xff]  }
 0x6e5   :  { %754 = vst.msk [vmem:[#allocation2 + $0x15] sm:$0x1] %vm493_vm5, %v752_v56  ;;  %2483 = vmatpush3.bf16.msra.mxu0 %v2740_v52  ;;  %v3399_v17 = vrot.slane %v685_v10, 2  ;;  %v2770_v45 = vld [vmem:[%s3697_s5 + $0x288] sm:$0xff]   ;;  %v2772_v50 = vld [vmem:[%s3697_s5 + $0x210] sm:$0xff]   ;;  %v2775_v52 = vld [vmem:[%s3697_s5 + $0x258] sm:$0xff]  }
 0x6e6   :  { %756 = vst.msk [vmem:[#allocation2 + $0x15] sm:$0x1] %vm508_vm6, %v3282_v16  ;;  %653 = vrot.lane.b32.xlu1 %v3364_v57, %s2870_s4  ;;  %2484 = vmatprep.subr.bf16.mxu0 %v2743_v53  ;;  %v2748_v16 = vld [vmem:[%s3697_s5 + $0x120] sm:$0xff]   ;;  %v2774_v39 = vld [vmem:[%s3697_s5 + $0x290] sm:$0xff]   ;;  %v2778_v56 = vld [vmem:[%s3697_s5 + $0x2d8] sm:$0xff]  }
 0x6e7   :  { %2505 = vmatpush3.bf16.msra.mxu1 %v2742_v55  ;;  %v590_v1 = vpop.permute.xlu0 %589  ;;  %v2782_v10 = vld [vmem:[%s3697_s5 + $0x2e0] sm:$0xff]  }
 0x6e8   :  { %592 = vst.msk [vmem:[#allocation2 + $0xe] sm:$0x1] %vm508_vm6, %v590_v1  ;;  %v605_v12 = vpop.permute.xlu1 %604  ;;  %662 = vrot.lane.b32.xlu0 %v3377_v62, %s2870_s4  ;;  %2506 = vmatprep.subr.bf16.mxu1 %v2745_v58  ;;  %v2776_v58 = vld [vmem:[%s3697_s5 + $0x218] sm:$0xff]   ;;  %v2781_v1 = vld [vmem:[%s3697_s5 + $0x220] sm:$0xff]  }
 0x6e9   :  { %607 = vst.msk [vmem:[#allocation2 + $0x10] sm:$0x1] %vm508_vm6, %v605_v12  ;;  %2485 = vmatpush3.bf16.msra.mxu0 %v2744_v61  ;;  %v2780_v61 = vld [vmem:[%s3697_s5 + $0x260] sm:$0xff]  }
 0x6ea   :  { %678 = vrot.lane.b32.xlu1 %v3388_v13, %s2870_s4  ;;  %2486 = vmatprep.subr.bf16.mxu0 %v2747_v8  ;;  %v2779_v8 = vld [vmem:[%s3697_s5 + $0x298] sm:$0xff]   ;;  %v2783_v12 = vld [vmem:[%s3697_s5 + $0x2a0] sm:$0xff]  }
 0x6eb   :  { %2507 = vmatpush3.bf16.msra.mxu1 %v2746_v5  ;;  %v746_v9 = vpop.permute.xlu0 %745  ;;  %v2784_v5 = vld [vmem:[%s3697_s5 + $0x268] sm:$0xff]  }
 0x6ec   :  { %748 = vst.msk [vmem:[#allocation2 + $0x13] sm:$0x1] %vm493_vm5, %v746_v9  ;;  %v630_v18 = vpop.permute.xlu1 %629  ;;  %687 = vrot.lane.b32.xlu0 %v3399_v17, %s2870_s4  ;;  %2508 = vmatprep.subr.bf16.mxu1 %v2749_v2  ;;  %v2786_v2 = vld [vmem:[%s3697_s5 + $0x2e8] sm:$0xff]  }
 0x6ed   :  { %750 = vst.msk [vmem:[#allocation2 + $0x13] sm:$0x1] %vm508_vm6, %v3268_v11  ;;  %632 = vst.msk [vmem:[#allocation2 + $0x14] sm:$0x1] %vm508_vm6, %v630_v18  ;;  %2487 = vmatpush3.bf16.msra.mxu0 %v2748_v16  ;;  %v2757_v11 = vld [vmem:[%s3697_s5 + $0x1f0] sm:$0xff]   ;;  %v2785_v16 = vld [vmem:[%s3697_s5 + $0x228] sm:$0xff]  }
 0x6ee   :  { %2488 = vmatprep.subr.bf16.mxu0 %v2751_v63  ;;  %v2788_v63 = vld [vmem:[%s3697_s5 + $0x270] sm:$0xff]   ;;  %v2787_v9 = vld [vmem:[%s3697_s5 + $0x2a8] sm:$0xff]  }
 0x6ef   :  { %2509 = vmatpush3.bf16.msra.mxu1 %v2750_v14  ;;  %v758_v22 = vpop.permute.xlu0 %757  ;;  %v788_v23 = vld [vmem:[#allocation2 + $0x8] sm:$0xff]  ;;  %v2790_v14 = vld [vmem:[%s3697_s5 + $0x2f0] sm:$0xff]  }
 0x6f0   :  { %760 = vst.msk [vmem:[#allocation2 + $0x17] sm:$0x1] %vm493_vm5, %v758_v22  ;;  %2510 = vmatprep.subr.bf16.mxu1 %v2753_v19  ;;  %v1075_v24 = vrot.slane %v788_v23, %v3095_v60  ;;  %v1068_v25 = vcombine.high %v788_v23, %v788_v23  ;;  %v2789_v18 = vld [vmem:[%s3697_s5 + $0x230] sm:$0xff]   ;;  %v2792_v19 = vld [vmem:[%s3697_s5 + $0x278] sm:$0xff]  }
 0x6f1   :  { %762 = vst.msk [vmem:[#allocation2 + $0x17] sm:$0x1] %vm508_vm6, %v3278_v15  ;;  %2489 = vmatpush3.bf16.msra.mxu0 %v2752_v20  ;;  %v2791_v20 = vld [vmem:[%s3697_s5 + $0x2b0] sm:$0xff]   ;;  %v2793_v22 = vld [vmem:[%s3697_s5 + $0x238] sm:$0xff]  }
 0x6f2   :  { %2490 = vmatprep.subr.bf16.mxu0 %v2755_v21  ;;  %v1083_v27 = vcombine.high %v1075_v24, %v1075_v24  ;;  %v1082_v29 = vrot.slane %v1068_v25, %v3095_v60  ;;  %v1139_v42 = vpack.c.bf16 %v1075_v24, %v1075_v24  ;;  %v2794_v21 = vld [vmem:[%s3697_s5 + $0x2f8] sm:$0xff]   ;;  %v2797_v24 = vld [vmem:[%s3697_s5 + $0x300] sm:$0xff]  }
 0x6f3   :  { %2511 = vmatpush3.bf16.msra.mxu1 %v2754_v4  ;;  %v614_v30 = vpop.permute.xlu0 %613  ;;  %v2796_v4 = vld [vmem:[%s3697_s5 + $0x340] sm:$0xff]   ;;  %v2795_v23 = vld [vmem:[%s3697_s5 + $0x2b8] sm:$0xff]  }
 0x6f4   :  { %616 = vst.msk [vmem:[#allocation2 + $0x12] sm:$0x1] %vm508_vm6, %v614_v30  ;;  %2512 = vmatprep.subr.bf16.mxu1 %v2757_v11  ;;  %v1140_v15 = vpack.c.bf16 %v1083_v27, %v1083_v27  ;;  %v1084_v32 = vcombine.high %v1082_v29, %v1082_v29  ;;  %v1141_v44 = vpack.c.bf16 %v1082_v29, %v1082_v29  ;;  %v2798_v11 = vld [vmem:[%s3697_s5 + $0x3c0] sm:$0xff]   ;;  %v2802_v29 = vld [vmem:[%s3697_s5 + $0x3c8] sm:$0xff]  }
 0x6f5   :  { %2491 = vmatpush3.bf16.msra.mxu0 %v2756_v26  ;;  %v2800_v26 = vld [vmem:[%s3697_s5 + $0x348] sm:$0xff]   ;;  %v2799_v27 = vld [vmem:[%s3697_s5 + $0x380] sm:$0xff]  }
 0x6f6   :  { %2038 = vmatprep.mubr.bf16.mxu0 %v1140_v15  ;;  %2492 = vmatprep.subr.bf16.mxu0 %v2759_v28  ;;  %v1142_v34 = vpack.c.bf16 %v1084_v32, %v1084_v32  ;;  %v2801_v30 = vld [vmem:[%s3697_s5 + $0x308] sm:$0xff]   ;;  %v2806_v32 = vld [vmem:[%s3697_s5 + $0x3d0] sm:$0xff]  }
 0x6f7   :  { %2513 = vmatpush3.bf16.msra.mxu1 %v2758_v31  ;;  %v639_v37 = vpop.permute.xlu0 %638  ;;  %v2804_v31 = vld [vmem:[%s3697_s5 + $0x350] sm:$0xff]   ;;  %v2803_v15 = vld [vmem:[%s3697_s5 + $0x388] sm:$0xff]  }
 0x6f8   :  { %641 = vst.msk [vmem:[#allocation2 + $0x16] sm:$0x1] %vm508_vm6, %v639_v37  ;;  %2078 = vmatprep.mubr.bf16.mxu1 %v1142_v34  ;;  %2514 = vmatprep.subr.bf16.mxu1 %v2761_v33  ;;  %v2805_v33 = vld [vmem:[%s3697_s5 + $0x310] sm:$0xff]   ;;  %v2809_v37 = vld [vmem:[%s3697_s5 + $0x318] sm:$0xff]  }
 0x6f9   :  { %2493 = vmatpush3.bf16.msra.mxu0 %v2760_v3  ;;  %v2808_v3 = vld [vmem:[%s3697_s5 + $0x358] sm:$0xff]   ;;  %v2807_v34 = vld [vmem:[%s3697_s5 + $0x390] sm:$0xff]  }
 0x6fa   :  { %2522 = vmatprep.subr.bf16.mxu0 %v2763_v35  ;;  %v2810_v35 = vld [vmem:[%s3697_s5 + $0x3d8] sm:$0xff]  }
 0x6fb   :  { %2515 = vmatpush3.bf16.msra.mxu1 %v2762_v40  ;;  %v2812_v40 = vld [vmem:[%s3697_s5 + $0x360] sm:$0xff]  }
 0x6fc   :  { %2039 = vmatmul.mubr.bf16.vlgmr.msra.gmra.mrb[20].mxu0 %v1139_v42  ;;  %2544 = vmatprep.subr.bf16.mxu1 %v2765_v0  ;;  %v2811_v0 = vld [vmem:[%s3697_s5 + $0x398] sm:$0xff]   ;;  %v2813_v42 = vld [vmem:[%s3697_s5 + $0x320] sm:$0xff]  }
 0x6fd   :  { %2523 = vmatpush3.bf16.msra.mxu0 %v2764_v41  ;;  %v2814_v41 = vld [vmem:[%s3697_s5 + $0x3e0] sm:$0xff]  }
 0x6fe   :  { %2079 = vmatmul.mubr.bf16.vlgmr.msra.gmra.mrb[12].mxu1 %v1141_v44  ;;  %2524 = vmatprep.subr.bf16.mxu0 %v2767_v7  ;;  %v2816_v7 = vld [vmem:[%s3697_s5 + $0x368] sm:$0xff]  }
 0x6ff   :  { %2545 = vmatpush3.bf16.msra.mxu1 %v2766_v43  ;;  %v789_v46 = vld [vmem:[#allocation2 + $0x10] sm:$0xff]  ;;  %v2815_v43 = vld [vmem:[%s3697_s5 + $0x3a0] sm:$0xff]   ;;  %v2818_v44 = vld [vmem:[%s3697_s5 + $0x3e8] sm:$0xff]  }
 0x700   :  { %2546 = vmatprep.subr.bf16.mxu1 %v2769_v6  ;;  %v3484_v48 = vrot.slane %v789_v46, %v3095_v60  ;;  %v1085_v49 = vcombine.high %v789_v46, %v789_v46  ;;  %v2817_v6 = vld [vmem:[%s3697_s5 + $0x328] sm:$0xff]   ;;  %v2821_v46 = vld [vmem:[%s3697_s5 + $0x330] sm:$0xff]  }
 0x701   :  { %2525 = vmatpush3.bf16.msra.mxu0 %v2768_v36  ;;  %v2820_v36 = vld [vmem:[%s3697_s5 + $0x370] sm:$0xff]  }
 0x702   :  { %2526 = vmatprep.subr.bf16.mxu0 %v2771_v38  ;;  %v1100_v51 = vcombine.high %v3484_v48, %v3484_v48  ;;  %v3495_v53 = vrot.slane %v1085_v49, %v3095_v60  ;;  %v1143_v25 = vpack.c.bf16 %v3484_v48, %v3484_v48  ;;  %v2819_v38 = vld [vmem:[%s3697_s5 + $0x3a8] sm:$0xff]   ;;  %v2823_v48 = vld [vmem:[%s3697_s5 + $0x3b0] sm:$0xff]   ;;  %v2826_v49 = vld [vmem:[%s3697_s5 + $0x3f8] sm:$0xff]  }
 0x703   :  { %2547 = vmatpush3.bf16.msra.mxu1 %v2770_v45  ;;  %v2822_v45 = vld [vmem:[%s3697_s5 + $0x3f0] sm:$0xff]  }
 0x704   :  { %2548 = vmatprep.subr.bf16.mxu1 %v2773_v47  ;;  %v1144_v54 = vpack.c.bf16 %v1100_v51, %v1100_v51  ;;  %v1101_v55 = vcombine.high %v3495_v53, %v3495_v53  ;;  %v1145_v28 = vpack.c.bf16 %v3495_v53, %v3495_v53  ;;  %v2824_v47 = vld [vmem:[%s3697_s5 + $0x378] sm:$0xff]  }
 0x705   :  { %2527 = vmatpush3.bf16.msra.mxu0 %v2772_v50  ;;  %v2825_v50 = vld [vmem:[%s3697_s5 + $0x338] sm:$0xff]  }
 0x706   :  { %2118 = vmatprep.mubr.bf16.mxu0 %v1144_v54  ;;  %2528 = vmatprep.subr.bf16.mxu0 %v2775_v52  ;;  %v1146_v59 = vpack.c.bf16 %v1101_v55, %v1101_v55  ;;  %v2827_v51 = vld [vmem:[%s3697_s5 + $0x3b8] sm:$0xff]  }
 0x707   :  { %2549 = vmatpush3.bf16.msra.mxu1 %v2774_v39 }
 0x708   :  { %2158 = vmatprep.mubr.bf16.mxu1 %v1146_v59  ;;  %2550 = vmatprep.subr.bf16.mxu1 %v2778_v56 }
 0x709   :  { %2529 = vmatpush3.bf16.msra.mxu0 %v2776_v58 }
 0x70a   :  { %2530 = vmatprep.subr.bf16.mxu0 %v2780_v61 }
 0x70b   :  { %2551 = vmatpush3.bf16.msra.mxu1 %v2779_v8 }
 0x70c   :  { %2552 = vmatprep.subr.bf16.mxu1 %v2782_v10 }
 0x70d   :  { %2531 = vmatpush3.bf16.msra.mxu0 %v2781_v1 }
 0x70e   :  { %2532 = vmatprep.subr.bf16.mxu0 %v2784_v5 }
 0x70f   :  { %2553 = vmatpush3.bf16.msra.mxu1 %v2783_v12 }
 0x710   :  { %2554 = vmatprep.subr.bf16.mxu1 %v2786_v2 }
 0x711   :  { %2533 = vmatpush3.bf16.msra.mxu0 %v2785_v16  ;;  %v2281_v16 = vld [vmem:[%s3699_s7] ss:$0 sm:$0xff]  ;;  %s2871_s7 = smov [#allocation3]  }
 0x712   :  { %2534 = vmatprep.subr.bf16.mxu0 %v2788_v63  ;;  %s2254_s25 = sshll.u32 %s2871_s7, 4  ;;  %s2255_s25 = int_to_ptr.vmem [resolvable:$true] %s2254_s25 }
 0x713   :  { %2555 = vmatpush3.bf16.msra.mxu1 %v2787_v9  ;;  %s2829_s26 = scalar_lea.vmem %s2255_s25, 32  ;;  %p2834_p1 = scmp.lt.s32.totalorder %s2255_s25, %s2255_s25 }
 0x714   :  { %2556 = vmatprep.subr.bf16.mxu1 %v2790_v14  ;;  %p2830_p0 = scmp.ne.s32.totalorder %s2255_s25, %s2829_s26  ;;  %p2835_p2 = scmp.lt.s32.totalorder %s2829_s26, %s2829_s26 }
 0x715   :  { %2535 = vmatpush3.bf16.msra.mxu0 %v2789_v18 }
 0x716   :  { %2536 = vmatprep.subr.bf16.mxu0 %v2792_v19  ;;  %p2836_p3 = por %p2835_p2, %p2834_p1 }
 0x717   :  { %2557 = vmatpush3.bf16.msra.mxu1 %v2791_v20 }
 0x718   :  { %2558 = vmatprep.subr.bf16.mxu1 %v2794_v21  ;;  %p2837_p4 = pnand %p2836_p3, %p2830_p0 }
 0x719   :  { %2537 = vmatpush3.bf16.msra.mxu0 %v2793_v22 }
 0x71a   :  { %2566 = vmatprep.subr.bf16.mxu0 %v2796_v4 }
 0x71b   :  { %2559 = vmatpush3.bf16.msra.mxu1 %v2795_v23 }
 0x71c   :  { %2119 = vmatmul.mubr.bf16.vlgmr.msra.gmra.mrb[24].mxu0 %v1143_v25  ;;  %2588 = vmatprep.subr.bf16.mxu1 %v2798_v11 }
 0x71d   :  { %2567 = vmatpush3.bf16.msra.mxu0 %v2797_v24 }
 0x71e   :  { %2159 = vmatmul.mubr.bf16.vlgmr.msra.gmra.mrb[16].mxu1 %v1145_v28  ;;  %2568 = vmatprep.subr.bf16.mxu0 %v2800_v26 }
 0x71f   :  { %2589 = vmatpush3.bf16.msra.mxu1 %v2799_v27 }
 0x720   :  { %2590 = vmatprep.subr.bf16.mxu1 %v2802_v29 }
 0x721   :  { %2569 = vmatpush3.bf16.msra.mxu0 %v2801_v30 }
 0x722   :  { %2570 = vmatprep.subr.bf16.mxu0 %v2804_v31 }
 0x723   :  { %2591 = vmatpush3.bf16.msra.mxu1 %v2803_v15 }
 0x724   :  { %2592 = vmatprep.subr.bf16.mxu1 %v2806_v32 }
 0x725   :  { %2571 = vmatpush3.bf16.msra.mxu0 %v2805_v33 }
 0x726   :  { %2572 = vmatprep.subr.bf16.mxu0 %v2808_v3 }
 0x727   :  { %2593 = vmatpush3.bf16.msra.mxu1 %v2807_v34 }
 0x728   :  { %2594 = vmatprep.subr.bf16.mxu1 %v2810_v35 }
 0x729   :  { %2573 = vmatpush3.bf16.msra.mxu0 %v2809_v37 }
 0x72a   :  { %2574 = vmatprep.subr.bf16.mxu0 %v2812_v40 }
 0x72b   :  { %2595 = vmatpush3.bf16.msra.mxu1 %v2811_v0 }
 0x72c   :  { %2596 = vmatprep.subr.bf16.mxu1 %v2814_v41 }
 0x72d   :  { %2575 = vmatpush3.bf16.msra.mxu0 %v2813_v42 }
 0x72e   :  { %2576 = vmatprep.subr.bf16.mxu0 %v2816_v7 }
 0x72f   :  { %2597 = vmatpush3.bf16.msra.mxu1 %v2815_v43 }
 0x730   :  { %2598 = vmatprep.subr.bf16.mxu1 %v2818_v44 }
 0x731   :  { %2577 = vmatpush3.bf16.msra.mxu0 %v2817_v6 }
 0x732   :  { %2578 = vmatprep.subr.bf16.mxu0 %v2820_v36 }
 0x733   :  { %2599 = vmatpush3.bf16.msra.mxu1 %v2819_v38 }
 0x734   :  { %2600 = vmatprep.subr.bf16.mxu1 %v2822_v45 }
 0x735   :  { %2579 = vmatpush3.bf16.msra.mxu0 %v2821_v46 }
 0x736   :  { %2580 = vmatprep.subr.bf16.mxu0 %v2824_v47 }
 0x737   :  { %2601 = vmatpush3.bf16.msra.mxu1 %v2823_v48 }
 0x738   :  { %2602 = vmatprep.subr.bf16.mxu1 %v2826_v49 }
 0x739   :  { %2581 = vmatpush3.bf16.msra.mxu0 %v2825_v50 }
 0x73b   :  { %2603 = vmatpush3.bf16.msra.mxu1 %v2827_v51 }
 0x750   :  { %v764_v52 = vpop.permute.xlu1 %763 }
 0x751   :  { %766 = vst.msk [vmem:[#allocation2 + $0x19] sm:$0x1] %vm493_vm5, %v764_v52 }
 0x752   :  { %768 = vst.msk [vmem:[#allocation2 + $0x19] sm:$0x1] %vm508_vm6, %v3364_v57  ;;  %v770_v53 = vpop.permute.xlu0 %769 }
 0x753   :  { %772 = vst.msk [vmem:[#allocation2 + $0x1b] sm:$0x1] %vm493_vm5, %v770_v53 }
 0x754   :  { %774 = vst.msk [vmem:[#allocation2 + $0x1b] sm:$0x1] %vm508_vm6, %v3377_v62  ;;  %v776_v39 = vpop.permute.xlu1 %775 }
 0x755   :  { %778 = vst.msk [vmem:[#allocation2 + $0x1d] sm:$0x1] %vm493_vm5, %v776_v39 }
 0x756   :  { %780 = vst.msk [vmem:[#allocation2 + $0x1d] sm:$0x1] %vm508_vm6, %v3388_v13  ;;  %v782_v54 = vpop.permute.xlu0 %781 }
 0x757   :  { %784 = vst.msk [vmem:[#allocation2 + $0x1f] sm:$0x1] %vm493_vm5, %v782_v54 }
 0x758   :  { %786 = vst.msk [vmem:[#allocation2 + $0x1f] sm:$0x1] %vm508_vm6, %v3399_v17  ;;  %v654_v55 = vpop.permute.xlu1 %653 }
 0x759   :  { %656 = vst.msk [vmem:[#allocation2 + $0x18] sm:$0x1] %vm508_vm6, %v654_v55 }
 0x75a   :  { %v663_v57 = vpop.permute.xlu0 %662 }
 0x75b   :  { %665 = vst.msk [vmem:[#allocation2 + $0x1a] sm:$0x1] %vm508_vm6, %v663_v57 }
 0x75c   :  { %v679_v56 = vpop.permute.xlu1 %678 }
 0x75d   :  { %681 = vst.msk [vmem:[#allocation2 + $0x1c] sm:$0x1] %vm508_vm6, %v679_v56 }
 0x75e   :  { %v688_v62 = vpop.permute.xlu0 %687 }
 0x75f   :  { %690 = vst.msk [vmem:[#allocation2 + $0x1e] sm:$0x1] %vm508_vm6, %v688_v62 }
 0x766   :  { %v790_v58 = vld [vmem:[#allocation2 + $0x18] sm:$0xff] }
 0x767   :  { %v1109_v13 = vrot.slane %v790_v58, %v3095_v60  ;;  %v1102_v59 = vcombine.high %v790_v58, %v790_v58 }
 0x769   :  { %v1117_v61 = vcombine.high %v1109_v13, %v1109_v13  ;;  %v1116_v8 = vrot.slane %v1102_v59, %v3095_v60  ;;  %v1147_v1 = vpack.c.bf16 %v1109_v13, %v1109_v13 }
 0x76b   :  { %v1148_v17 = vpack.c.bf16 %v1117_v61, %v1117_v61  ;;  %v1118_v10 = vcombine.high %v1116_v8, %v1116_v8  ;;  %v1149_v12 = vpack.c.bf16 %v1116_v8, %v1116_v8 }
 0x76d   :  { %2198 = vmatprep.mubr.bf16.mxu0 %v1148_v17  ;;  %v1150_v5 = vpack.c.bf16 %v1118_v10, %v1118_v10 }
 0x76e   :  { %2199 = vmatmul.mubr.bf16.vlgmr.msra.gmra.mrb[28].mxu0 %v1147_v1 }
 0x76f   :  { %2238 = vmatprep.mubr.bf16.mxu1 %v1150_v5 }
 0x770   :  { %2239 = vmatmul.mubr.bf16.vlgmr.msra.gmra.mrb[20].mxu1 %v1149_v12 }
 0x7af   :  { %v2450_v2 = vpop.f32.mrb[16].mxu0 }
 0x7b0   :  { %v2451_v63 = vpop.f32.mrb[17].mxu0 }
 0x7b1   :  { %v2452_v9 = vadd.f32 %v2451_v63, %v2450_v2  ;;  %v2453_v14 = vpop.f32.mrb[18].mxu0  ;;  %v2472_v18 = vpop.f32.mrb[8].mxu1 }
 0x7b2   :  { %v2454_v19 = vpop.f32.mrb[19].mxu0  ;;  %v2473_v60 = vpop.f32.mrb[9].mxu1 }
 0x7b3   :  { %v1961_v20 = vadd.f32 %v2452_v9, %v2281_v16  ;;  %v2474_v21 = vadd.f32 %v2473_v60, %v2472_v18  ;;  %v2475_v22 = vpop.f32.mrb[10].mxu1 }
 0x7b4   :  { %v2476_v4 = vpop.f32.mrb[11].mxu1 }
 0x7b5   :  { %v2001_v23 = vadd.f32 %v2474_v21, %v1961_v20 }
 0x7cf   :  { %v2494_v11 = vpop.f32.mrb[20].mxu0 }
 0x7d0   :  { %v2495_v24 = vpop.f32.mrb[21].mxu0 }
 0x7d1   :  { %v2496_v25 = vadd.f32 %v2495_v24, %v2494_v11  ;;  %v2497_v26 = vpop.f32.mrb[22].mxu0  ;;  %v2516_v27 = vpop.f32.mrb[12].mxu1 }
 0x7d2   :  { %v2498_v28 = vpop.f32.mrb[23].mxu0  ;;  %v2517_v29 = vpop.f32.mrb[13].mxu1 }
 0x7d3   :  { %v2041_v30 = vadd.f32 %v2496_v25, %v2001_v23  ;;  %v2518_v31 = vadd.f32 %v2517_v29, %v2516_v27  ;;  %v2519_v15 = vpop.f32.mrb[14].mxu1 }
 0x7d4   :  { %v2520_v32 = vpop.f32.mrb[15].mxu1 }
 0x7d5   :  { %v2081_v33 = vadd.f32 %v2518_v31, %v2041_v30 }
 0x7ef   :  { %v2538_v3 = vpop.f32.mrb[24].mxu0 }
 0x7f0   :  { %v2539_v34 = vpop.f32.mrb[25].mxu0 }
 0x7f1   :  { %v2540_v35 = vadd.f32 %v2539_v34, %v2538_v3  ;;  %v2541_v37 = vpop.f32.mrb[26].mxu0  ;;  %v2560_v40 = vpop.f32.mrb[16].mxu1 }
 0x7f2   :  { %v2542_v0 = vpop.f32.mrb[27].mxu0  ;;  %v2561_v41 = vpop.f32.mrb[17].mxu1 }
 0x7f3   :  { %v2121_v42 = vadd.f32 %v2540_v35, %v2081_v33  ;;  %v2562_v7 = vadd.f32 %v2561_v41, %v2560_v40  ;;  %v2563_v43 = vpop.f32.mrb[18].mxu1 }
 0x7f4   :  { %v2564_v44 = vpop.f32.mrb[19].mxu1 }
 0x7f5   :  { %v2161_v6 = vadd.f32 %v2562_v7, %v2121_v42 }
 0x841   :  { %v2582_v36 = vpop.f32.mrb[28].mxu0 }
 0x842   :  { %v2583_v38 = vpop.f32.mrb[29].mxu0 }
 0x843   :  { %v2584_v45 = vadd.f32 %v2583_v38, %v2582_v36  ;;  %v2585_v46 = vpop.f32.mrb[30].mxu0  ;;  %v2604_v47 = vpop.f32.mrb[20].mxu1 }
 0x844   :  { %v2586_v48 = vpop.f32.mrb[31].mxu0  ;;  %v2605_v49 = vpop.f32.mrb[21].mxu1 }
 0x845   :  { %v2201_v50 = vadd.f32 %v2584_v45, %v2161_v6  ;;  %v2606_v51 = vadd.f32 %v2605_v49, %v2604_v47  ;;  %v2607_v52 = vpop.f32.mrb[22].mxu1 }
 0x846   :  { %v2608_v53 = vpop.f32.mrb[23].mxu1 }
 0x847   :  { %v2241_v39 = vadd.f32 %v2606_v51, %v2201_v50 }
 0x849   :  { %2247 = vst.msk [vmem:[#allocation3] sm:$0x3] %vm2246_vm7, %v2241_v39 }
 0x84a   :  { %2840 = shalt.err (!%p2837_p4)
}
 0x84b   :  { %s2841_s29 = scalar_lea.hbm %s3700_s8, 32 }
 0x84c   :  { %p2842_p5 = scmp.ne.s32.totalorder %s3700_s8, %s2841_s29  ;;  %p2845_p6 = scmp.lt.u32.totalorder %s2841_s29, %s3700_s8 }
 0x84e   :  { %p2847_p7 = pnand %p2845_p6, %p2842_p5 }
 0x850   :  { %2850 = shalt.err (!%p2847_p7)
}
 0x851   :  { %2257 = dma.vmem_to_hbm [thread:$0]  %s2255_s25, 32, %s3700_s8, [#allocation4]  }
 0x852   :  { %2851 = dma.done.wait [#allocation4], 32  }
 0x853   :  { %2852 = vsyncadd [#allocation4], 4294967264 }
 0x854   :  { %2261 = vsyncpa [#allocation4], 1 }

</bundles_post_ra>
